<compile_context>
chip_gen: v5e
topology: v5e:2x2
jax: 0.10.0
libtpu: 0.0.40
codegen_flags: <defaults>
</compile_context>

<pallas_src>
import functools

import jax
import jax.numpy as jnp
from jax.experimental import pallas as pl
from jax.experimental.pallas import tpu as pltpu

C_IN = 3       # RGB input channels
STEM = 8       # stem / MBConv block width
EXP = 32       # expanded width (expand ratio 4)
SE_RED = 2     # squeeze-excite reduced width (se ratio 0.25)
HEAD = 32      # head width == `feature` fed to the final Linear(feature, 1)


# =============================================================================
# Single fused Pallas kernel (one image per grid step)
# =============================================================================
def _our_cnn_kernel(xcol_ref, stem_w_ref, stem_s_ref, stem_b_ref,
                    exp_w_ref, exp_s_ref, exp_b_ref,
                    dw_w_ref, dw_s_ref, dw_b_ref,
                    se1_w_ref, se1_b_ref, se2_w_ref, se2_b_ref,
                    proj_wt_ref, proj_s_ref, proj_b_ref,
                    head_w_ref, head_s_ref, head_b_ref,
                    fc_w_ref, fc_b_ref,
                    out_ref, epad_ref, *, Ho, Wo, inv_hw):
    f32 = jnp.float32
    bf16 = jnp.bfloat16
    HW = Ho * Wo

    # ---- stem conv 3x3 / stride 2 + BN + swish: one whole-image matmul ------
    xcol = xcol_ref[0].astype(bf16)                               # (HW, 9*C_IN)
    y = jnp.dot(xcol, stem_w_ref[...], preferred_element_type=f32)
    y = y * stem_s_ref[...] + stem_b_ref[...]
    y = y * jax.nn.sigmoid(y)                                     # (HW, STEM) f32
    res = y                                                       # residual (VMEM value)

    # ---- expand 1x1 + BN + swish ---------------------------------------------
    e = jnp.dot(y.astype(bf16), exp_w_ref[...], preferred_element_type=f32)
    e = e * exp_s_ref[...] + exp_b_ref[...]
    e = e * jax.nn.sigmoid(e)                                     # (HW, EXP) f32

    # padded depthwise input lives only in a small VMEM scratch (12.8 KiB);
    # zeroing the whole slab each step keeps the border correct under
    # "parallel" megacore sharding and is negligible at this scale.
    epad_ref[...] = jnp.zeros_like(epad_ref)
    epad_ref[1:Ho + 1, 1:Wo + 1, :] = e.reshape(Ho, Wo, EXP)

    # ---- depthwise 3x3 stride 1 + BN + swish (slice the scratch ref per tap) -
    # TODO(synk): at real scale, lane-pack W*EXP onto the lane axis (XLU rolls
    # for the W-shifts) to lift the 32/128 lane utilization of this section.
    dw_w = dw_w_ref[...]                                          # (3, 3, EXP), hoisted
    acc = jnp.zeros((Ho, Wo, EXP), f32)
    for dh in range(3):
        for dw in range(3):
            acc = acc + epad_ref[dh:dh + Ho, dw:dw + Wo, :] * dw_w[dh, dw]
    h = acc * dw_s_ref[...] + dw_b_ref[...]
    h = h * jax.nn.sigmoid(h)                                     # (Ho, Wo, EXP) f32
    h2 = h.reshape(HW, EXP)

    # ---- squeeze-excite: global pool + two tiny FCs, all VMEM-resident -------
    pooled = jnp.sum(h2, axis=0, keepdims=True) * inv_hw          # (1, EXP)
    se = jnp.dot(pooled, se1_w_ref[...], preferred_element_type=f32) + se1_b_ref[...]
    se = se * jax.nn.sigmoid(se)                                  # (1, SE_RED)
    se = jnp.dot(se, se2_w_ref[...], preferred_element_type=f32) + se2_b_ref[...]
    se = jax.nn.sigmoid(se)                                       # (1, EXP)

    # ---- project 1x1: SE scale folded into the tiny (STEM, EXP) weight -------
    # (h * se) @ W == h @ (se[:,None] * W); weight is stored transposed so the
    # fold is a lane-wise broadcast multiply, then a tiny f32 transpose.
    pw = (proj_wt_ref[...].astype(f32) * se).T.astype(bf16)       # (EXP, STEM)
    p = jnp.dot(h2.astype(bf16), pw, preferred_element_type=f32)
    p = p * proj_s_ref[...] + proj_b_ref[...] + res               # residual add, f32

    # ---- head 1x1 conv + BN + swish -------------------------------------------
    f = jnp.dot(p.astype(bf16), head_w_ref[...], preferred_element_type=f32)
    f = f * head_s_ref[...] + head_b_ref[...]
    f = f * jax.nn.sigmoid(f)                                     # (HW, HEAD)

    # TODO(synk): EfficientNet applies dropout before _fc; identity in eval mode.
    # ---- global average pool + Linear(feature, 1) -----------------------------
    fp = jnp.sum(f, axis=0, keepdims=True) * inv_hw               # (1, HEAD)
    out_ref[0] = (jnp.sum(fp * fc_w_ref[...], axis=-1, keepdims=True)
                  + fc_b_ref[...])


# =============================================================================
# pallas_call wrapper
# =============================================================================
def _bspec(shape):
    """Whole (small) array, same block for every grid step (DMA'd once)."""
    return pl.BlockSpec(shape, lambda b: (0,) * len(shape))


_COMPILER_PARAMS = pltpu.CompilerParams(
    # images are independent -> "parallel" feeds both v7x TensorCores at B>=2;
    # 32 MiB scoped VMEM is headroom on v5e/v6e and under v7x's 64 MiB physical.
    dimension_semantics=("parallel",),
    vmem_limit_bytes=32 * 1024 * 1024,
)


def _run_fused(xcol, params, Ho, Wo):
    B, HW, K = xcol.shape
    kernel = functools.partial(_our_cnn_kernel, Ho=Ho, Wo=Wo, inv_hw=1.0 / HW)
    out = pl.pallas_call(
        kernel,
        out_shape=jax.ShapeDtypeStruct((B, 1, 1), jnp.float32),
        grid=(B,),
        in_specs=[
            pl.BlockSpec((1, HW, K), lambda b: (b, 0, 0)),
            _bspec((K, STEM)), _bspec((1, STEM)), _bspec((1, STEM)),
            _bspec((STEM, EXP)), _bspec((1, EXP)), _bspec((1, EXP)),
            _bspec((3, 3, EXP)), _bspec((1, EXP)), _bspec((1, EXP)),
            _bspec((EXP, SE_RED)), _bspec((1, SE_RED)),
            _bspec((SE_RED, EXP)), _bspec((1, EXP)),
            _bspec((STEM, EXP)), _bspec((1, STEM)), _bspec((1, STEM)),
            _bspec((STEM, HEAD)), _bspec((1, HEAD)), _bspec((1, HEAD)),
            _bspec((1, HEAD)), _bspec((1, 1)),
        ],
        out_specs=pl.BlockSpec((1, 1, 1), lambda b: (b, 0, 0)),
        scratch_shapes=[pltpu.VMEM((Ho + 2, Wo + 2, EXP), jnp.float32)],
        compiler_params=_COMPILER_PARAMS,
    )(xcol, params["stem_w"], params["stem_s"], params["stem_b"],
      params["exp_w"], params["exp_s"], params["exp_b"],
      params["dw_w"], params["dw_s"], params["dw_b"],
      params["se1_w"], params["se1_b"], params["se2_w"], params["se2_b"],
      params["proj_wt"], params["proj_s"], params["proj_b"],
      params["head_w"], params["head_s"], params["head_b"],
      params["fc_w"], params["fc_b"])
    return out[:, 0, :]                                            # (B, 1)


# =============================================================================
# Parameters (BN folded, inference) and forward
# =============================================================================
def bn_fold(gamma, beta, mean, var, eps=1e-3):
    scale = gamma / jnp.sqrt(var + eps)
    return scale, beta - mean * scale


def init_params(key):
    keys = jax.random.split(key, 32)
    it = iter(keys)

    def nrm(shape, s=0.1):
        return jax.random.normal(next(it), shape, jnp.float32) * s

    def bn(c):
        gamma = 1.0 + nrm((c,), 0.05)
        beta = nrm((c,), 0.05)
        mean = nrm((c,), 0.05)
        var = 1.0 + jnp.abs(nrm((c,), 0.05))
        s, b = bn_fold(gamma, beta, mean, var)
        return s.reshape(1, c), b.reshape(1, c)

    def mxu(w):
        # matmul weights stored bf16 (MXU operands); accumulation stays f32.
        return w.astype(jnp.bfloat16)

    p = {}
    # stem 3x3 stride-2 conv: dense (3,3,C_IN,STEM) form for the pure-JAX
    # reference; the kernel gets the same weights reshaped to (27, STEM).
    w4 = nrm((3, 3, C_IN, STEM)).astype(jnp.bfloat16).astype(jnp.float32)
    p["stem_w4"] = w4
    p["stem_w"] = mxu(w4.reshape(9 * C_IN, STEM))
    p["stem_s"], p["stem_b"] = bn(STEM)

    p["exp_w"] = mxu(nrm((STEM, EXP)));   p["exp_s"], p["exp_b"] = bn(EXP)
    p["dw_w"] = nrm((3, 3, EXP));         p["dw_s"], p["dw_b"] = bn(EXP)
    p["se1_w"] = nrm((EXP, SE_RED));      p["se1_b"] = nrm((SE_RED,)).reshape(1, SE_RED)
    p["se2_w"] = nrm((SE_RED, EXP));      p["se2_b"] = nrm((EXP,)).reshape(1, EXP)
    # projection weight stored transposed (STEM, EXP) so the per-image SE
    # channel scale folds in as a lane-wise broadcast.
    p["proj_wt"] = mxu(nrm((STEM, EXP))); p["proj_s"], p["proj_b"] = bn(STEM)
    p["head_w"] = mxu(nrm((STEM, HEAD))); p["head_s"], p["head_b"] = bn(HEAD)
    p["fc_w"] = nrm((1, HEAD));           p["fc_b"] = nrm((1,)).reshape(1, 1)
    return p


def our_cnn_forward(params, x_nchw):
    """EfficientNet-style backbone + Linear(feature, 1).  Input is NCHW."""
    x = jnp.transpose(x_nchw, (0, 2, 3, 1)).astype(jnp.float32)   # -> NHWC
    B, H, W, _ = x.shape
    Ho, Wo = H // 2, W // 2
    # Only host-side prep: a stride-2 im2col of the tiny 3-channel input
    # (Ho*Wo x 27 per image, ~2.25x the raw bytes); no activation-sized slabs
    # ever round-trip HBM.
    xp = jnp.pad(x, ((0, 0), (1, 1), (1, 1), (0, 0)))
    cols = [xp[:, dh:dh + 2 * Ho:2, dw:dw + 2 * Wo:2, :]
            for dh in range(3) for dw in range(3)]
    xcol = jnp.concatenate(cols, axis=-1).reshape(B, Ho * Wo, 9 * C_IN)
    return _run_fused(xcol, params, Ho, Wo)                        # (B, 1)


# =============================================================================
# Pure-JAX reference (same folded parameters) for a numerical self-check
# =============================================================================
def reference_forward(params, x_nchw):
    x = jnp.transpose(x_nchw, (0, 2, 3, 1)).astype(jnp.float32)
    B, H, W, _ = x.shape
    Ho, Wo = H // 2, W // 2
    HW = Ho * Wo
    swish = lambda t: t * jax.nn.sigmoid(t)

    # stem conv3x3/s2/p1 via im2col
    xp = jnp.pad(x, ((0, 0), (1, 1), (1, 1), (0, 0)))
    patches = []
    for i in range(3):
        for j in range(3):
            patches.append(xp[:, i:i + 2 * Ho:2, j:j + 2 * Wo:2, :])
    cols = jnp.concatenate(patches, axis=-1).reshape(B * HW, 9 * C_IN)
    y = cols @ params["stem_w4"].reshape(9 * C_IN, STEM)
    y = swish(y * params["stem_s"] + params["stem_b"])
    res = y

    e = swish((y @ params["exp_w"].astype(jnp.float32)) * params["exp_s"] + params["exp_b"])
    e4 = e.reshape(B, Ho, Wo, EXP)
    ep = jnp.pad(e4, ((0, 0), (1, 1), (1, 1), (0, 0)))
    acc = jnp.zeros((B, Ho, Wo, EXP), jnp.float32)
    for dh in range(3):
        for dw in range(3):
            acc = acc + ep[:, dh:dh + Ho, dw:dw + Wo, :] * params["dw_w"][dh, dw, :]
    h = swish(acc * params["dw_s"] + params["dw_b"])
    h2 = h.reshape(B, HW, EXP)

    pooled = jnp.mean(h2, axis=1)                                  # (B, EXP)
    se = swish(pooled @ params["se1_w"] + params["se1_b"])
    se = jax.nn.sigmoid(se @ params["se2_w"] + params["se2_b"])
    hs = (h2 * se[:, None, :]).reshape(B * HW, EXP)

    p = (hs @ params["proj_wt"].astype(jnp.float32).T) * params["proj_s"] + params["proj_b"] + res
    f = swish((p @ params["head_w"].astype(jnp.float32)) * params["head_s"] + params["head_b"])
    fp = jnp.mean(f.reshape(B, HW, HEAD), axis=1)                  # (B, HEAD)
    return fp @ params["fc_w"].T + params["fc_b"]                  # (B, 1)


if __name__ == "__main__":
    key = jax.random.PRNGKey(0)
    pkey, xkey = jax.random.split(key)
    params = init_params(pkey)
    x = jax.random.normal(xkey, (2, C_IN, 16, 16), jnp.float32)    # NCHW like PyTorch

    out = our_cnn_forward(params, x)
    out = jax.block_until_ready(out)
    assert out.shape == (2, 1) and out.dtype == jnp.float32

    ref = reference_forward(params, x)
    # tolerance covers bf16 MXU-operand rounding (all intermediates stay f32)
    assert bool(jnp.all(jnp.abs(out - ref) < 2e-2)), (out, ref)

    print("KERNEL_OK")
</pallas_src>

<mosaic_0001>
module attributes {stable_mosaic.version = 11 : i64} {
  func.func @_our_cnn_kernel(%arg0: i32, %arg1: memref<1x64x27xf32, #tpu.memory_space<vmem>>, %arg2: memref<27x8xbf16, #tpu.memory_space<vmem>>, %arg3: memref<1x8xf32, #tpu.memory_space<vmem>>, %arg4: memref<1x8xf32, #tpu.memory_space<vmem>>, %arg5: memref<8x32xbf16, #tpu.memory_space<vmem>>, %arg6: memref<1x32xf32, #tpu.memory_space<vmem>>, %arg7: memref<1x32xf32, #tpu.memory_space<vmem>>, %arg8: memref<3x3x32xf32, #tpu.memory_space<vmem>>, %arg9: memref<1x32xf32, #tpu.memory_space<vmem>>, %arg10: memref<1x32xf32, #tpu.memory_space<vmem>>, %arg11: memref<32x2xf32, #tpu.memory_space<vmem>>, %arg12: memref<1x2xf32, #tpu.memory_space<vmem>>, %arg13: memref<2x32xf32, #tpu.memory_space<vmem>>, %arg14: memref<1x32xf32, #tpu.memory_space<vmem>>, %arg15: memref<8x32xbf16, #tpu.memory_space<vmem>>, %arg16: memref<1x8xf32, #tpu.memory_space<vmem>>, %arg17: memref<1x8xf32, #tpu.memory_space<vmem>>, %arg18: memref<8x32xbf16, #tpu.memory_space<vmem>>, %arg19: memref<1x32xf32, #tpu.memory_space<vmem>>, %arg20: memref<1x32xf32, #tpu.memory_space<vmem>>, %arg21: memref<1x32xf32, #tpu.memory_space<vmem>>, %arg22: memref<1x1xf32, #tpu.memory_space<vmem>>, %arg23: memref<1x1x1xf32, #tpu.memory_space<vmem>>, %arg24: memref<10x10x32xf32, #tpu.memory_space<vmem>>) attributes {dimension_semantics = [#tpu.dimension_semantics<parallel>], iteration_bounds = array<i64: 2>, scalar_prefetch = 0 : i64, scratch_operands = 1 : i64, tpu.core_type = #tpu.core_type<tc>, window_params = [{transform_indices = @transform_0, window_bounds = array<i64: 1, 64, 27>}, {pipeline_mode = #tpu.pipeline_mode<synchronous>, transform_indices = @transform_1, window_bounds = array<i64: 27, 8>}, {pipeline_mode = #tpu.pipeline_mode<synchronous>, transform_indices = @transform_2, window_bounds = array<i64: 1, 8>}, {pipeline_mode = #tpu.pipeline_mode<synchronous>, transform_indices = @transform_3, window_bounds = array<i64: 1, 8>}, {pipeline_mode = #tpu.pipeline_mode<synchronous>, transform_indices = @transform_4, window_bounds = array<i64: 8, 32>}, {pipeline_mode = #tpu.pipeline_mode<synchronous>, transform_indices = @transform_5, window_bounds = array<i64: 1, 32>}, {pipeline_mode = #tpu.pipeline_mode<synchronous>, transform_indices = @transform_6, window_bounds = array<i64: 1, 32>}, {pipeline_mode = #tpu.pipeline_mode<synchronous>, transform_indices = @transform_7, window_bounds = array<i64: 3, 3, 32>}, {pipeline_mode = #tpu.pipeline_mode<synchronous>, transform_indices = @transform_8, window_bounds = array<i64: 1, 32>}, {pipeline_mode = #tpu.pipeline_mode<synchronous>, transform_indices = @transform_9, window_bounds = array<i64: 1, 32>}, {pipeline_mode = #tpu.pipeline_mode<synchronous>, transform_indices = @transform_10, window_bounds = array<i64: 32, 2>}, {pipeline_mode = #tpu.pipeline_mode<synchronous>, transform_indices = @transform_11, window_bounds = array<i64: 1, 2>}, {pipeline_mode = #tpu.pipeline_mode<synchronous>, transform_indices = @transform_12, window_bounds = array<i64: 2, 32>}, {pipeline_mode = #tpu.pipeline_mode<synchronous>, transform_indices = @transform_13, window_bounds = array<i64: 1, 32>}, {pipeline_mode = #tpu.pipeline_mode<synchronous>, transform_indices = @transform_14, window_bounds = array<i64: 8, 32>}, {pipeline_mode = #tpu.pipeline_mode<synchronous>, transform_indices = @transform_15, window_bounds = array<i64: 1, 8>}, {pipeline_mode = #tpu.pipeline_mode<synchronous>, transform_indices = @transform_16, window_bounds = array<i64: 1, 8>}, {pipeline_mode = #tpu.pipeline_mode<synchronous>, transform_indices = @transform_17, window_bounds = array<i64: 8, 32>}, {pipeline_mode = #tpu.pipeline_mode<synchronous>, transform_indices = @transform_18, window_bounds = array<i64: 1, 32>}, {pipeline_mode = #tpu.pipeline_mode<synchronous>, transform_indices = @transform_19, window_bounds = array<i64: 1, 32>}, {pipeline_mode = #tpu.pipeline_mode<synchronous>, transform_indices = @transform_20, window_bounds = array<i64: 1, 32>}, {pipeline_mode = #tpu.pipeline_mode<synchronous>, transform_indices = @transform_21, window_bounds = array<i64: 1, 1>}, {transform_indices = @transform_22, window_bounds = array<i64: 1, 1, 1>}]} {
    %c0 = arith.constant 0 : index
    %c0_0 = arith.constant 0 : index
    %c0_1 = arith.constant 0 : index
    %0 = vector.load %arg1[%c0, %c0_0, %c0_1] : memref<1x64x27xf32, #tpu.memory_space<vmem>>, vector<1x64x27xf32>
    %1 = vector.shape_cast %0 : vector<1x64x27xf32> to vector<64x27xf32>
    %2 = arith.truncf %1 : vector<64x27xf32> to vector<64x27xbf16>
    %c0_2 = arith.constant 0 : index
    %c0_3 = arith.constant 0 : index
    %3 = vector.load %arg2[%c0_2, %c0_3] : memref<27x8xbf16, #tpu.memory_space<vmem>>, vector<27x8xbf16>
    %cst = arith.constant dense<0.000000e+00> : vector<64x8xf32>
    %4 = tpu.matmul %2, %3, %cst {dimension_numbers = #tpu.dot_dimension_numbers<[1], [0], [0], [1], [0, 0, 1, 1], [], []>} : vector<64x27xbf16>, vector<27x8xbf16>, vector<64x8xf32> -> vector<64x8xf32>
    %c0_4 = arith.constant 0 : index
    %c0_5 = arith.constant 0 : index
    %5 = vector.load %arg3[%c0_4, %c0_5] : memref<1x8xf32, #tpu.memory_space<vmem>>, vector<1x8xf32>
    %6 = vector.broadcast %5 : vector<1x8xf32> to vector<64x8xf32>
    %7 = arith.mulf %4, %6 : vector<64x8xf32>
    %c0_6 = arith.constant 0 : index
    %c0_7 = arith.constant 0 : index
    %8 = vector.load %arg4[%c0_6, %c0_7] : memref<1x8xf32, #tpu.memory_space<vmem>>, vector<1x8xf32>
    %9 = vector.broadcast %8 : vector<1x8xf32> to vector<64x8xf32>
    %10 = arith.addf %7, %9 : vector<64x8xf32>
    %11 = arith.negf %10 : vector<64x8xf32>
    %12 = math.exp %11 : vector<64x8xf32>
    %cst_8 = arith.constant 1.000000e+00 : f32
    %13 = vector.broadcast %cst_8 : f32 to vector<64x8xf32>
    %14 = arith.addf %13, %12 : vector<64x8xf32>
    %15 = arith.divf %13, %14 : vector<64x8xf32>
    %16 = arith.mulf %10, %15 : vector<64x8xf32>
    %17 = arith.truncf %16 : vector<64x8xf32> to vector<64x8xbf16>
    %c0_9 = arith.constant 0 : index
    %c0_10 = arith.constant 0 : index
    %18 = vector.load %arg5[%c0_9, %c0_10] : memref<8x32xbf16, #tpu.memory_space<vmem>>, vector<8x32xbf16>
    %cst_11 = arith.constant dense<0.000000e+00> : vector<64x32xf32>
    %19 = tpu.matmul %17, %18, %cst_11 {dimension_numbers = #tpu.dot_dimension_numbers<[1], [0], [0], [1], [0, 0, 1, 1], [], []>} : vector<64x8xbf16>, vector<8x32xbf16>, vector<64x32xf32> -> vector<64x32xf32>
    %c0_12 = arith.constant 0 : index
    %c0_13 = arith.constant 0 : index
    %20 = vector.load %arg6[%c0_12, %c0_13] : memref<1x32xf32, #tpu.memory_space<vmem>>, vector<1x32xf32>
    %21 = vector.broadcast %20 : vector<1x32xf32> to vector<64x32xf32>
    %22 = arith.mulf %19, %21 : vector<64x32xf32>
    %c0_14 = arith.constant 0 : index
    %c0_15 = arith.constant 0 : index
    %23 = vector.load %arg7[%c0_14, %c0_15] : memref<1x32xf32, #tpu.memory_space<vmem>>, vector<1x32xf32>
    %24 = vector.broadcast %23 : vector<1x32xf32> to vector<64x32xf32>
    %25 = arith.addf %22, %24 : vector<64x32xf32>
    %26 = arith.negf %25 : vector<64x32xf32>
    %27 = math.exp %26 : vector<64x32xf32>
    %cst_16 = arith.constant 1.000000e+00 : f32
    %28 = vector.broadcast %cst_16 : f32 to vector<64x32xf32>
    %29 = arith.addf %28, %27 : vector<64x32xf32>
    %30 = arith.divf %28, %29 : vector<64x32xf32>
    %31 = arith.mulf %25, %30 : vector<64x32xf32>
    %cst_17 = arith.constant 0.000000e+00 : f32
    %32 = vector.broadcast %cst_17 : f32 to vector<10x10x32xf32>
    %c0_18 = arith.constant 0 : index
    %c0_19 = arith.constant 0 : index
    %c0_20 = arith.constant 0 : index
    %33 = vector.load %arg24[%c0_18, %c0_19, %c0_20] : memref<10x10x32xf32, #tpu.memory_space<vmem>>, vector<10x10x32xf32>
    tpu.vector_store %arg24[%c0_18, %c0_19, %c0_20], %32 {strides = array<i32>} : memref<10x10x32xf32, #tpu.memory_space<vmem>>, vector<10x10x32xf32>,
    %34 = vector.shape_cast %31 : vector<64x32xf32> to vector<8x8x32xf32>
    %c1 = arith.constant 1 : index
    %c1_21 = arith.constant 1 : index
    %c0_22 = arith.constant 0 : index
    %35 = vector.load %arg24[%c1, %c1_21, %c0_22] : memref<10x10x32xf32, #tpu.memory_space<vmem>>, vector<8x8x32xf32>
    tpu.vector_store %arg24[%c1, %c1_21, %c0_22], %34 {strides = array<i32>} : memref<10x10x32xf32, #tpu.memory_space<vmem>>, vector<8x8x32xf32>,
    %c0_23 = arith.constant 0 : index
    %c0_24 = arith.constant 0 : index
    %c0_25 = arith.constant 0 : index
    %36 = vector.load %arg8[%c0_23, %c0_24, %c0_25] : memref<3x3x32xf32, #tpu.memory_space<vmem>>, vector<3x3x32xf32>
    %cst_26 = arith.constant 0.000000e+00 : f32
    %37 = vector.broadcast %cst_26 : f32 to vector<8x8x32xf32>
    %c0_27 = arith.constant 0 : index
    %c0_28 = arith.constant 0 : index
    %c0_29 = arith.constant 0 : index
    %38 = vector.load %arg24[%c0_27, %c0_28, %c0_29] : memref<10x10x32xf32, #tpu.memory_space<vmem>>, vector<8x8x32xf32>
    %39 = vector.extract_strided_slice %36 {offsets = [0, 0, 0], sizes = [1, 1, 32], strides = [1, 1, 1]} : vector<3x3x32xf32> to vector<1x1x32xf32>
    %40 = vector.shape_cast %39 : vector<1x1x32xf32> to vector<32xf32>
    %41 = vector.shape_cast %40 : vector<32xf32> to vector<1x1x32xf32>
    %42 = vector.broadcast %41 : vector<1x1x32xf32> to vector<8x8x32xf32>
    %43 = arith.mulf %38, %42 : vector<8x8x32xf32>
    %44 = arith.addf %37, %43 : vector<8x8x32xf32>
    %c0_30 = arith.constant 0 : index
    %c1_31 = arith.constant 1 : index
    %c0_32 = arith.constant 0 : index
    %45 = vector.load %arg24[%c0_30, %c1_31, %c0_32] : memref<10x10x32xf32, #tpu.memory_space<vmem>>, vector<8x8x32xf32>
    %46 = vector.extract_strided_slice %36 {offsets = [0, 1, 0], sizes = [1, 1, 32], strides = [1, 1, 1]} : vector<3x3x32xf32> to vector<1x1x32xf32>
    %47 = vector.shape_cast %46 : vector<1x1x32xf32> to vector<32xf32>
    %48 = vector.shape_cast %47 : vector<32xf32> to vector<1x1x32xf32>
    %49 = vector.broadcast %48 : vector<1x1x32xf32> to vector<8x8x32xf32>
    %50 = arith.mulf %45, %49 : vector<8x8x32xf32>
    %51 = arith.addf %44, %50 : vector<8x8x32xf32>
    %c0_33 = arith.constant 0 : index
    %c2 = arith.constant 2 : index
    %c0_34 = arith.constant 0 : index
    %52 = vector.load %arg24[%c0_33, %c2, %c0_34] : memref<10x10x32xf32, #tpu.memory_space<vmem>>, vector<8x8x32xf32>
    %53 = vector.extract_strided_slice %36 {offsets = [0, 2, 0], sizes = [1, 1, 32], strides = [1, 1, 1]} : vector<3x3x32xf32> to vector<1x1x32xf32>
    %54 = vector.shape_cast %53 : vector<1x1x32xf32> to vector<32xf32>
    %55 = vector.shape_cast %54 : vector<32xf32> to vector<1x1x32xf32>
    %56 = vector.broadcast %55 : vector<1x1x32xf32> to vector<8x8x32xf32>
    %57 = arith.mulf %52, %56 : vector<8x8x32xf32>
    %58 = arith.addf %51, %57 : vector<8x8x32xf32>
    %c1_35 = arith.constant 1 : index
    %c0_36 = arith.constant 0 : index
    %c0_37 = arith.constant 0 : index
    %59 = vector.load %arg24[%c1_35, %c0_36, %c0_37] : memref<10x10x32xf32, #tpu.memory_space<vmem>>, vector<8x8x32xf32>
    %60 = vector.extract_strided_slice %36 {offsets = [1, 0, 0], sizes = [1, 1, 32], strides = [1, 1, 1]} : vector<3x3x32xf32> to vector<1x1x32xf32>
    %61 = vector.shape_cast %60 : vector<1x1x32xf32> to vector<32xf32>
    %62 = vector.shape_cast %61 : vector<32xf32> to vector<1x1x32xf32>
    %63 = vector.broadcast %62 : vector<1x1x32xf32> to vector<8x8x32xf32>
    %64 = arith.mulf %59, %63 : vector<8x8x32xf32>
    %65 = arith.addf %58, %64 : vector<8x8x32xf32>
    %c1_38 = arith.constant 1 : index
    %c1_39 = arith.constant 1 : index
    %c0_40 = arith.constant 0 : index
    %66 = vector.load %arg24[%c1_38, %c1_39, %c0_40] : memref<10x10x32xf32, #tpu.memory_space<vmem>>, vector<8x8x32xf32>
    %67 = vector.extract_strided_slice %36 {offsets = [1, 1, 0], sizes = [1, 1, 32], strides = [1, 1, 1]} : vector<3x3x32xf32> to vector<1x1x32xf32>
    %68 = vector.shape_cast %67 : vector<1x1x32xf32> to vector<32xf32>
    %69 = vector.shape_cast %68 : vector<32xf32> to vector<1x1x32xf32>
    %70 = vector.broadcast %69 : vector<1x1x32xf32> to vector<8x8x32xf32>
    %71 = arith.mulf %66, %70 : vector<8x8x32xf32>
    %72 = arith.addf %65, %71 : vector<8x8x32xf32>
    %c1_41 = arith.constant 1 : index
    %c2_42 = arith.constant 2 : index
    %c0_43 = arith.constant 0 : index
    %73 = vector.load %arg24[%c1_41, %c2_42, %c0_43] : memref<10x10x32xf32, #tpu.memory_space<vmem>>, vector<8x8x32xf32>
    %74 = vector.extract_strided_slice %36 {offsets = [1, 2, 0], sizes = [1, 1, 32], strides = [1, 1, 1]} : vector<3x3x32xf32> to vector<1x1x32xf32>
    %75 = vector.shape_cast %74 : vector<1x1x32xf32> to vector<32xf32>
    %76 = vector.shape_cast %75 : vector<32xf32> to vector<1x1x32xf32>
    %77 = vector.broadcast %76 : vector<1x1x32xf32> to vector<8x8x32xf32>
    %78 = arith.mulf %73, %77 : vector<8x8x32xf32>
    %79 = arith.addf %72, %78 : vector<8x8x32xf32>
    %c2_44 = arith.constant 2 : index
    %c0_45 = arith.constant 0 : index
    %c0_46 = arith.constant 0 : index
    %80 = vector.load %arg24[%c2_44, %c0_45, %c0_46] : memref<10x10x32xf32, #tpu.memory_space<vmem>>, vector<8x8x32xf32>
    %81 = vector.extract_strided_slice %36 {offsets = [2, 0, 0], sizes = [1, 1, 32], strides = [1, 1, 1]} : vector<3x3x32xf32> to vector<1x1x32xf32>
    %82 = vector.shape_cast %81 : vector<1x1x32xf32> to vector<32xf32>
    %83 = vector.shape_cast %82 : vector<32xf32> to vector<1x1x32xf32>
    %84 = vector.broadcast %83 : vector<1x1x32xf32> to vector<8x8x32xf32>
    %85 = arith.mulf %80, %84 : vector<8x8x32xf32>
    %86 = arith.addf %79, %85 : vector<8x8x32xf32>
    %c2_47 = arith.constant 2 : index
    %c1_48 = arith.constant 1 : index
    %c0_49 = arith.constant 0 : index
    %87 = vector.load %arg24[%c2_47, %c1_48, %c0_49] : memref<10x10x32xf32, #tpu.memory_space<vmem>>, vector<8x8x32xf32>
    %88 = vector.extract_strided_slice %36 {offsets = [2, 1, 0], sizes = [1, 1, 32], strides = [1, 1, 1]} : vector<3x3x32xf32> to vector<1x1x32xf32>
    %89 = vector.shape_cast %88 : vector<1x1x32xf32> to vector<32xf32>
    %90 = vector.shape_cast %89 : vector<32xf32> to vector<1x1x32xf32>
    %91 = vector.broadcast %90 : vector<1x1x32xf32> to vector<8x8x32xf32>
    %92 = arith.mulf %87, %91 : vector<8x8x32xf32>
    %93 = arith.addf %86, %92 : vector<8x8x32xf32>
    %c2_50 = arith.constant 2 : index
    %c2_51 = arith.constant 2 : index
    %c0_52 = arith.constant 0 : index
    %94 = vector.load %arg24[%c2_50, %c2_51, %c0_52] : memref<10x10x32xf32, #tpu.memory_space<vmem>>, vector<8x8x32xf32>
    %95 = vector.extract_strided_slice %36 {offsets = [2, 2, 0], sizes = [1, 1, 32], strides = [1, 1, 1]} : vector<3x3x32xf32> to vector<1x1x32xf32>
    %96 = vector.shape_cast %95 : vector<1x1x32xf32> to vector<32xf32>
    %97 = vector.shape_cast %96 : vector<32xf32> to vector<1x1x32xf32>
    %98 = vector.broadcast %97 : vector<1x1x32xf32> to vector<8x8x32xf32>
    %99 = arith.mulf %94, %98 : vector<8x8x32xf32>
    %100 = arith.addf %93, %99 : vector<8x8x32xf32>
    %c0_53 = arith.constant 0 : index
    %c0_54 = arith.constant 0 : index
    %101 = vector.load %arg9[%c0_53, %c0_54] : memref<1x32xf32, #tpu.memory_space<vmem>>, vector<1x32xf32>
    %102 = vector.shape_cast %101 : vector<1x32xf32> to vector<1x1x32xf32>
    %103 = vector.broadcast %102 : vector<1x1x32xf32> to vector<8x8x32xf32>
    %104 = arith.mulf %100, %103 : vector<8x8x32xf32>
    %c0_55 = arith.constant 0 : index
    %c0_56 = arith.constant 0 : index
    %105 = vector.load %arg10[%c0_55, %c0_56] : memref<1x32xf32, #tpu.memory_space<vmem>>, vector<1x32xf32>
    %106 = vector.shape_cast %105 : vector<1x32xf32> to vector<1x1x32xf32>
    %107 = vector.broadcast %106 : vector<1x1x32xf32> to vector<8x8x32xf32>
    %108 = arith.addf %104, %107 : vector<8x8x32xf32>
    %109 = arith.negf %108 : vector<8x8x32xf32>
    %110 = math.exp %109 : vector<8x8x32xf32>
    %cst_57 = arith.constant 1.000000e+00 : f32
    %111 = vector.broadcast %cst_57 : f32 to vector<8x8x32xf32>
    %112 = arith.addf %111, %110 : vector<8x8x32xf32>
    %113 = arith.divf %111, %112 : vector<8x8x32xf32>
    %114 = arith.mulf %108, %113 : vector<8x8x32xf32>
    %115 = vector.shape_cast %114 : vector<8x8x32xf32> to vector<64x32xf32>
    %cst_58 = arith.constant dense<0.000000e+00> : vector<32xf32>
    %116 = vector.multi_reduction <add>, %115, %cst_58 [0] : vector<64x32xf32> to vector<32xf32>
    %117 = vector.shape_cast %116 : vector<32xf32> to vector<1x32xf32>
    %cst_59 = arith.constant 1.562500e-02 : f32
    %118 = vector.broadcast %cst_59 : f32 to vector<1x32xf32>
    %119 = arith.mulf %117, %118 : vector<1x32xf32>
    %c0_60 = arith.constant 0 : index
    %c0_61 = arith.constant 0 : index
    %120 = vector.load %arg11[%c0_60, %c0_61] : memref<32x2xf32, #tpu.memory_space<vmem>>, vector<32x2xf32>
    %cst_62 = arith.constant dense<0.000000e+00> : vector<1x2xf32>
    %121 = tpu.matmul %119, %120, %cst_62 {dimension_numbers = #tpu.dot_dimension_numbers<[1], [0], [0], [1], [0, 0, 1, 1], [], []>} : vector<1x32xf32>, vector<32x2xf32>, vector<1x2xf32> -> vector<1x2xf32>
    %c0_63 = arith.constant 0 : index
    %c0_64 = arith.constant 0 : index
    %122 = vector.load %arg12[%c0_63, %c0_64] : memref<1x2xf32, #tpu.memory_space<vmem>>, vector<1x2xf32>
    %123 = arith.addf %121, %122 : vector<1x2xf32>
    %124 = arith.negf %123 : vector<1x2xf32>
    %125 = math.exp %124 : vector<1x2xf32>
    %cst_65 = arith.constant 1.000000e+00 : f32
    %126 = vector.broadcast %cst_65 : f32 to vector<1x2xf32>
    %127 = arith.addf %126, %125 : vector<1x2xf32>
    %128 = arith.divf %126, %127 : vector<1x2xf32>
    %129 = arith.mulf %123, %128 : vector<1x2xf32>
    %c0_66 = arith.constant 0 : index
    %c0_67 = arith.constant 0 : index
    %130 = vector.load %arg13[%c0_66, %c0_67] : memref<2x32xf32, #tpu.memory_space<vmem>>, vector<2x32xf32>
    %cst_68 = arith.constant dense<0.000000e+00> : vector<1x32xf32>
    %131 = tpu.matmul %129, %130, %cst_68 {dimension_numbers = #tpu.dot_dimension_numbers<[1], [0], [0], [1], [0, 0, 1, 1], [], []>} : vector<1x2xf32>, vector<2x32xf32>, vector<1x32xf32> -> vector<1x32xf32>
    %c0_69 = arith.constant 0 : index
    %c0_70 = arith.constant 0 : index
    %132 = vector.load %arg14[%c0_69, %c0_70] : memref<1x32xf32, #tpu.memory_space<vmem>>, vector<1x32xf32>
    %133 = arith.addf %131, %132 : vector<1x32xf32>
    %134 = arith.negf %133 : vector<1x32xf32>
    %135 = math.exp %134 : vector<1x32xf32>
    %cst_71 = arith.constant 1.000000e+00 : f32
    %136 = vector.broadcast %cst_71 : f32 to vector<1x32xf32>
    %137 = arith.addf %136, %135 : vector<1x32xf32>
    %138 = arith.divf %136, %137 : vector<1x32xf32>
    %c0_72 = arith.constant 0 : index
    %c0_73 = arith.constant 0 : index
    %139 = vector.load %arg15[%c0_72, %c0_73] : memref<8x32xbf16, #tpu.memory_space<vmem>>, vector<8x32xbf16>
    %140 = arith.extf %139 : vector<8x32xbf16> to vector<8x32xf32>
    %141 = vector.broadcast %138 : vector<1x32xf32> to vector<8x32xf32>
    %142 = arith.mulf %140, %141 : vector<8x32xf32>
    %143 = tpu.transpose %142, [1, 0] : vector<8x32xf32> -> vector<32x8xf32>
    %144 = arith.truncf %143 : vector<32x8xf32> to vector<32x8xbf16>
    %145 = arith.truncf %115 : vector<64x32xf32> to vector<64x32xbf16>
    %cst_74 = arith.constant dense<0.000000e+00> : vector<64x8xf32>
    %146 = tpu.matmul %145, %144, %cst_74 {dimension_numbers = #tpu.dot_dimension_numbers<[1], [0], [0], [1], [0, 0, 1, 1], [], []>} : vector<64x32xbf16>, vector<32x8xbf16>, vector<64x8xf32> -> vector<64x8xf32>
    %c0_75 = arith.constant 0 : index
    %c0_76 = arith.constant 0 : index
    %147 = vector.load %arg16[%c0_75, %c0_76] : memref<1x8xf32, #tpu.memory_space<vmem>>, vector<1x8xf32>
    %148 = vector.broadcast %147 : vector<1x8xf32> to vector<64x8xf32>
    %149 = arith.mulf %146, %148 : vector<64x8xf32>
    %c0_77 = arith.constant 0 : index
    %c0_78 = arith.constant 0 : index
    %150 = vector.load %arg17[%c0_77, %c0_78] : memref<1x8xf32, #tpu.memory_space<vmem>>, vector<1x8xf32>
    %151 = vector.broadcast %150 : vector<1x8xf32> to vector<64x8xf32>
    %152 = arith.addf %149, %151 : vector<64x8xf32>
    %153 = arith.addf %152, %16 : vector<64x8xf32>
    %154 = arith.truncf %153 : vector<64x8xf32> to vector<64x8xbf16>
    %c0_79 = arith.constant 0 : index
    %c0_80 = arith.constant 0 : index
    %155 = vector.load %arg18[%c0_79, %c0_80] : memref<8x32xbf16, #tpu.memory_space<vmem>>, vector<8x32xbf16>
    %cst_81 = arith.constant dense<0.000000e+00> : vector<64x32xf32>
    %156 = tpu.matmul %154, %155, %cst_81 {dimension_numbers = #tpu.dot_dimension_numbers<[1], [0], [0], [1], [0, 0, 1, 1], [], []>} : vector<64x8xbf16>, vector<8x32xbf16>, vector<64x32xf32> -> vector<64x32xf32>
    %c0_82 = arith.constant 0 : index
    %c0_83 = arith.constant 0 : index
    %157 = vector.load %arg19[%c0_82, %c0_83] : memref<1x32xf32, #tpu.memory_space<vmem>>, vector<1x32xf32>
    %158 = vector.broadcast %157 : vector<1x32xf32> to vector<64x32xf32>
    %159 = arith.mulf %156, %158 : vector<64x32xf32>
    %c0_84 = arith.constant 0 : index
    %c0_85 = arith.constant 0 : index
    %160 = vector.load %arg20[%c0_84, %c0_85] : memref<1x32xf32, #tpu.memory_space<vmem>>, vector<1x32xf32>
    %161 = vector.broadcast %160 : vector<1x32xf32> to vector<64x32xf32>
    %162 = arith.addf %159, %161 : vector<64x32xf32>
    %163 = arith.negf %162 : vector<64x32xf32>
    %164 = math.exp %163 : vector<64x32xf32>
    %cst_86 = arith.constant 1.000000e+00 : f32
    %165 = vector.broadcast %cst_86 : f32 to vector<64x32xf32>
    %166 = arith.addf %165, %164 : vector<64x32xf32>
    %167 = arith.divf %165, %166 : vector<64x32xf32>
    %168 = arith.mulf %162, %167 : vector<64x32xf32>
    %cst_87 = arith.constant dense<0.000000e+00> : vector<32xf32>
    %169 = vector.multi_reduction <add>, %168, %cst_87 [0] : vector<64x32xf32> to vector<32xf32>
    %170 = vector.shape_cast %169 : vector<32xf32> to vector<1x32xf32>
    %cst_88 = arith.constant 1.562500e-02 : f32
    %171 = vector.broadcast %cst_88 : f32 to vector<1x32xf32>
    %172 = arith.mulf %170, %171 : vector<1x32xf32>
    %c0_89 = arith.constant 0 : index
    %c0_90 = arith.constant 0 : index
    %173 = vector.load %arg21[%c0_89, %c0_90] : memref<1x32xf32, #tpu.memory_space<vmem>>, vector<1x32xf32>
    %174 = arith.mulf %172, %173 : vector<1x32xf32>
    %cst_91 = arith.constant dense<0.000000e+00> : vector<1xf32>
    %175 = vector.multi_reduction <add>, %174, %cst_91 [1] : vector<1x32xf32> to vector<1xf32>
    %176 = vector.shape_cast %175 : vector<1xf32> to vector<1x1xf32>
    %c0_92 = arith.constant 0 : index
    %c0_93 = arith.constant 0 : index
    %177 = vector.load %arg22[%c0_92, %c0_93] : memref<1x1xf32, #tpu.memory_space<vmem>>, vector<1x1xf32>
    %178 = arith.addf %176, %177 : vector<1x1xf32>
    %c0_94 = arith.constant 0 : index
    %c0_95 = arith.constant 0 : index
    %c0_96 = arith.constant 0 : index
    %179 = vector.load %arg23[%c0_94, %c0_95, %c0_96] : memref<1x1x1xf32, #tpu.memory_space<vmem>>, vector<1x1x1xf32>
    %180 = vector.shape_cast %179 : vector<1x1x1xf32> to vector<1x1xf32>
    %181 = vector.shape_cast %178 : vector<1x1xf32> to vector<1x1x1xf32>
    tpu.vector_store %arg23[%c0_94, %c0_95, %c0_96], %181 {strides = array<i32>} : memref<1x1x1xf32, #tpu.memory_space<vmem>>, vector<1x1x1xf32>,
    return
  }
  func.func @transform_0(%arg0: i32) -> (i32, i32, i32) {
    %c0_i32 = arith.constant 0 : i32
    %c0_i32_0 = arith.constant 0 : i32
    %c0_i32_1 = arith.constant 0 : i32
    return %arg0, %c0_i32, %c0_i32_0 : i32, i32, i32
  }
  func.func @transform_1(%arg0: i32) -> (i32, i32) {
    %c0_i32 = arith.constant 0 : i32
    %c0_i32_0 = arith.constant 0 : i32
    %c0_i32_1 = arith.constant 0 : i32
    return %c0_i32, %c0_i32_0 : i32, i32
  }
  func.func @transform_2(%arg0: i32) -> (i32, i32) {
    %c0_i32 = arith.constant 0 : i32
    %c0_i32_0 = arith.constant 0 : i32
    %c0_i32_1 = arith.constant 0 : i32
    return %c0_i32, %c0_i32_0 : i32, i32
  }
  func.func @transform_3(%arg0: i32) -> (i32, i32) {
    %c0_i32 = arith.constant 0 : i32
    %c0_i32_0 = arith.constant 0 : i32
    %c0_i32_1 = arith.constant 0 : i32
    return %c0_i32, %c0_i32_0 : i32, i32
  }
  func.func @transform_4(%arg0: i32) -> (i32, i32) {
    %c0_i32 = arith.constant 0 : i32
    %c0_i32_0 = arith.constant 0 : i32
    %c0_i32_1 = arith.constant 0 : i32
    return %c0_i32, %c0_i32_0 : i32, i32
  }
  func.func @transform_5(%arg0: i32) -> (i32, i32) {
    %c0_i32 = arith.constant 0 : i32
    %c0_i32_0 = arith.constant 0 : i32
    %c0_i32_1 = arith.constant 0 : i32
    return %c0_i32, %c0_i32_0 : i32, i32
  }
  func.func @transform_6(%arg0: i32) -> (i32, i32) {
    %c0_i32 = arith.constant 0 : i32
    %c0_i32_0 = arith.constant 0 : i32
    %c0_i32_1 = arith.constant 0 : i32
    return %c0_i32, %c0_i32_0 : i32, i32
  }
  func.func @transform_7(%arg0: i32) -> (i32, i32, i32) {
    %c0_i32 = arith.constant 0 : i32
    %c0_i32_0 = arith.constant 0 : i32
    %c0_i32_1 = arith.constant 0 : i32
    %c0_i32_2 = arith.constant 0 : i32
    return %c0_i32, %c0_i32_0, %c0_i32_1 : i32, i32, i32
  }
  func.func @transform_8(%arg0: i32) -> (i32, i32) {
    %c0_i32 = arith.constant 0 : i32
    %c0_i32_0 = arith.constant 0 : i32
    %c0_i32_1 = arith.constant 0 : i32
    return %c0_i32, %c0_i32_0 : i32, i32
  }
  func.func @transform_9(%arg0: i32) -> (i32, i32) {
    %c0_i32 = arith.constant 0 : i32
    %c0_i32_0 = arith.constant 0 : i32
    %c0_i32_1 = arith.constant 0 : i32
    return %c0_i32, %c0_i32_0 : i32, i32
  }
  func.func @transform_10(%arg0: i32) -> (i32, i32) {
    %c0_i32 = arith.constant 0 : i32
    %c0_i32_0 = arith.constant 0 : i32
    %c0_i32_1 = arith.constant 0 : i32
    return %c0_i32, %c0_i32_0 : i32, i32
  }
  func.func @transform_11(%arg0: i32) -> (i32, i32) {
    %c0_i32 = arith.constant 0 : i32
    %c0_i32_0 = arith.constant 0 : i32
    %c0_i32_1 = arith.constant 0 : i32
    return %c0_i32, %c0_i32_0 : i32, i32
  }
  func.func @transform_12(%arg0: i32) -> (i32, i32) {
    %c0_i32 = arith.constant 0 : i32
    %c0_i32_0 = arith.constant 0 : i32
    %c0_i32_1 = arith.constant 0 : i32
    return %c0_i32, %c0_i32_0 : i32, i32
  }
  func.func @transform_13(%arg0: i32) -> (i32, i32) {
    %c0_i32 = arith.constant 0 : i32
    %c0_i32_0 = arith.constant 0 : i32
    %c0_i32_1 = arith.constant 0 : i32
    return %c0_i32, %c0_i32_0 : i32, i32
  }
  func.func @transform_14(%arg0: i32) -> (i32, i32) {
    %c0_i32 = arith.constant 0 : i32
    %c0_i32_0 = arith.constant 0 : i32
    %c0_i32_1 = arith.constant 0 : i32
    return %c0_i32, %c0_i32_0 : i32, i32
  }
  func.func @transform_15(%arg0: i32) -> (i32, i32) {
    %c0_i32 = arith.constant 0 : i32
    %c0_i32_0 = arith.constant 0 : i32
    %c0_i32_1 = arith.constant 0 : i32
    return %c0_i32, %c0_i32_0 : i32, i32
  }
  func.func @transform_16(%arg0: i32) -> (i32, i32) {
    %c0_i32 = arith.constant 0 : i32
    %c0_i32_0 = arith.constant 0 : i32
    %c0_i32_1 = arith.constant 0 : i32
    return %c0_i32, %c0_i32_0 : i32, i32
  }
  func.func @transform_17(%arg0: i32) -> (i32, i32) {
    %c0_i32 = arith.constant 0 : i32
    %c0_i32_0 = arith.constant 0 : i32
    %c0_i32_1 = arith.constant 0 : i32
    return %c0_i32, %c0_i32_0 : i32, i32
  }
  func.func @transform_18(%arg0: i32) -> (i32, i32) {
    %c0_i32 = arith.constant 0 : i32
    %c0_i32_0 = arith.constant 0 : i32
    %c0_i32_1 = arith.constant 0 : i32
    return %c0_i32, %c0_i32_0 : i32, i32
  }
  func.func @transform_19(%arg0: i32) -> (i32, i32) {
    %c0_i32 = arith.constant 0 : i32
    %c0_i32_0 = arith.constant 0 : i32
    %c0_i32_1 = arith.constant 0 : i32
    return %c0_i32, %c0_i32_0 : i32, i32
  }
  func.func @transform_20(%arg0: i32) -> (i32, i32) {
    %c0_i32 = arith.constant 0 : i32
    %c0_i32_0 = arith.constant 0 : i32
    %c0_i32_1 = arith.constant 0 : i32
    return %c0_i32, %c0_i32_0 : i32, i32
  }
  func.func @transform_21(%arg0: i32) -> (i32, i32) {
    %c0_i32 = arith.constant 0 : i32
    %c0_i32_0 = arith.constant 0 : i32
    %c0_i32_1 = arith.constant 0 : i32
    return %c0_i32, %c0_i32_0 : i32, i32
  }
  func.func @transform_22(%arg0: i32) -> (i32, i32, i32) {
    %c0_i32 = arith.constant 0 : i32
    %c0_i32_0 = arith.constant 0 : i32
    %c0_i32_1 = arith.constant 0 : i32
    return %arg0, %c0_i32, %c0_i32_0 : i32, i32, i32
  }
}

</mosaic_0001>

<bundles_post_ra>
// kernel: tpu_custom_call.1
= control target key start
LH: loop header
LB: loop body
LE: loop exit
PB: predicated region body
PF: predicated region fallthrough
CT: control target
= control target key end

     0   :  { %s2525_s29 = smov 0   ;;  %s3461_s0 = inlined_call_operand.vmem [shape: f32[2,64,27], index: 0, kind: input, shape index: {}]   ;;  %s3462_s1 = inlined_call_operand.vmem [shape: bf16[27,8], index: 1, kind: input, shape index: {}]   ;;  %s3463_s2 = inlined_call_operand.vmem [shape: f32[1,8], index: 2, kind: input, shape index: {}]   ;;  %s3464_s3 = inlined_call_operand.vmem [shape: f32[1,8], index: 3, kind: input, shape index: {}]   ;;  %s3465_s4 = inlined_call_operand.vmem [shape: bf16[8,32], index: 4, kind: input, shape index: {}]   ;;  %s3466_s5 = inlined_call_operand.vmem [shape: f32[1,32], index: 5, kind: input, shape index: {}]   ;;  %s3467_s6 = inlined_call_operand.vmem [shape: f32[1,32], index: 6, kind: input, shape index: {}]   ;;  %s3468_s7 = inlined_call_operand.vmem [shape: f32[3,3,32], index: 7, kind: input, shape index: {}]   ;;  %s3469_s8 = inlined_call_operand.vmem [shape: f32[1,32], index: 8, kind: input, shape index: {}]   ;;  %s3470_s9 = inlined_call_operand.vmem [shape: f32[1,32], index: 9, kind: input, shape index: {}]   ;;  %s3471_s10 = inlined_call_operand.vmem [shape: f32[32,2], index: 10, kind: input, shape index: {}]   ;;  %s3472_s11 = inlined_call_operand.vmem [shape: f32[1,2], index: 11, kind: input, shape index: {}]   ;;  %s3473_s12 = inlined_call_operand.vmem [shape: f32[2,32], index: 12, kind: input, shape index: {}]   ;;  %s3474_s13 = inlined_call_operand.vmem [shape: f32[1,32], index: 13, kind: input, shape index: {}]   ;;  %s3475_s14 = inlined_call_operand.vmem [shape: bf16[8,32], index: 14, kind: input, shape index: {}]   ;;  %s3476_s15 = inlined_call_operand.vmem [shape: f32[1,8], index: 15, kind: input, shape index: {}]   ;;  %s3477_s16 = inlined_call_operand.vmem [shape: f32[1,8], index: 16, kind: input, shape index: {}]   ;;  %s3478_s17 = inlined_call_operand.vmem [shape: bf16[8,32], index: 17, kind: input, shape index: {}]   ;;  %s3479_s18 = inlined_call_operand.vmem [shape: f32[1,32], index: 18, kind: input, shape index: {}]   ;;  %s3480_s19 = inlined_call_operand.vmem [shape: f32[1,32], index: 19, kind: input, shape index: {}]   ;;  %s3481_s20 = inlined_call_operand.vmem [shape: f32[1,32], index: 20, kind: input, shape index: {}]   ;;  %s3482_s21 = inlined_call_operand.<no memory space> [shape: f32[1,1], index: 21, kind: input, shape index: {}]   ;;  %s3483_s22 = inlined_call_operand.vmem [shape: f32[2,1,1], index: 22, kind: output, shape index: {}]  }
   0x1   :  { %3486 = sst [smem:[#allocation4_spill]] %s3461_s0  ;;  %v27_v0 = vstv %s3482_s21 }
   0x2   :  { %3487 = sst [smem:[#allocation5_spill]] %s3462_s1  ;;  %28 = vst [vmem:[#allocation3] sm:$0x1] %v27_v0 }
   0x3   :  { %3488 = sst [smem:[#allocation6_spill]] %s3463_s2 }
   0x4   :  { %3489 = sst [smem:[#allocation7_spill]] %s3464_s3 }
   0x5   :  { %3490 = sst [smem:[#allocation8_spill]] %s3465_s4 }
   0x6   :  { %3491 = sst [smem:[#allocation9_spill]] %s3466_s5 }
   0x7   :  { %3492 = sst [smem:[#allocation10_spill]] %s3467_s6 }
   0x8 LB: > { %s2168_s30 = sadd.s32 4294967295, %s2403_s29   ;;  %p2172_p0 = scmp.ge.s32.totalorder %s2403_s29, 1  ;;  %s2403_s29 = sphi %s2525_s29, %s34_s29  }
   0x9   : > { %p614_p1 = scmp.lt.s32.totalorder %s2403_s29, 3 }
   0xb   : > { %p615_p2 = pnand %p2172_p0, %p614_p1 }
   0xc   : > { %s3493_s23 = sld [smem:[#allocation5_spill]] (!%p615_p2)  ;;  %p674_p3 = scmp.lt.s32.totalorder (!%p615_p2), %s2168_s30, 1 }
   0xd   : > { %618 = sbr.rel (%p615_p2) target bundleno = 1521 (0x5f1), region = 108  ;;  %s3494_s2 = sld [smem:[#allocation4_spill]] (!%p615_p2) }
   0xe   : > { %s3495_s4 = sld [smem:[#allocation6_spill]] (!%p615_p2) }
   0xf   : > { %s3496_s1 = sld [smem:[#allocation7_spill]] (!%p615_p2) }
  0x10   : > { %s3497_s6 = sld [smem:[#allocation8_spill]] (!%p615_p2) }
  0x11   : > { %s3499_s28 = sld [smem:[#allocation10_spill]] (!%p615_p2) }
  0x12   : > { %v2181_v1 = vld [vmem:[%s3493_s23 + $0x8] sm:$0xf]  ;;  %v2240_v2 = vld [vmem:[%s3493_s23 + $0x8] sm:$0x30]  ;;  %vm723_vm0 = vcmask 1044480   ;;  %vm724_vm1 = vcmask 1045504  }
  0x13   : > { %v2182_v3 = vor.u32 %v2240_v2, %v2181_v1  ;;  %v2405_v4 = vmov 65535   ;;  %s3549_s30 = smov (!%p674_p3, %s2168_s30), 1  ;;  %v2239_v8 = vld [vmem:[%s3493_s23] sm:$0xff]  ;;  %vm710_vm2 = vcmask 220160   ;;  %vm961_vm3 = vcmask 1043456  }
  0x14   : > { %v725_v5 = vsel %vm723_vm0, 4294967295, %v2405_v4  ;;  %s2238_s5 = sshll.u32 %s3549_s30, 6  ;;  %v2551_v21 = vld [vmem:[%s3495_s4] ss:$0 sm:$0xff]  ;;  %vm3485_vm12 = vcmask 64512   ;;  %s681_s0 = scalar_lea.vmem %s3483_s22, %s3549_s30 }
  0x15   : > { %v726_v6 = vsel %vm724_vm1, %v725_v5, 0  ;;  %s678_s27 = scalar_lea.vmem %s3494_s2, %s2238_s5  ;;  %v2556_v22 = vld [vmem:[%s3496_s1] ss:$0 sm:$0xff]  ;;  %s3498_s2 = sld [smem:[#allocation9_spill]] }
  0x16   : > { %v728_v7 = vand.u32 %v2182_v3, %v726_v6  ;;  %v683_v9 = vld [vmem:[%s678_s27] sm:$0xff]  ;;  %v684_v10 = vld [vmem:[%s678_s27 + $0x8] sm:$0xff]  ;;  %v685_v12 = vld [vmem:[%s678_s27 + $0x10] sm:$0xff] }
  0x17   : > { %v691_v11 = vpack.c.bf16 %v684_v10, %v683_v9  ;;  %v686_v13 = vld [vmem:[%s678_s27 + $0x18] sm:$0xff]  ;;  %v687_v15 = vld [vmem:[%s678_s27 + $0x20] sm:$0xff]  ;;  %v688_v16 = vld [vmem:[%s678_s27 + $0x28] sm:$0xff] }
  0x18   : > { %736 = vmatpush.bf16.msra.mxu0 %v728_v7  ;;  %v692_v14 = vpack.c.bf16 %v686_v13, %v685_v12  ;;  %v693_v17 = vpack.c.bf16 %v688_v16, %v687_v15  ;;  %v689_v18 = vld [vmem:[%s678_s27 + $0x30] sm:$0xff]  ;;  %v690_v19 = vld [vmem:[%s678_s27 + $0x38] sm:$0xff]  ;;  %v947_v29 = vld [vmem:[%s3497_s6] sm:$0xf] }
  0x19   : > { %v694_v20 = vpack.c.bf16 %v690_v19, %v689_v18  ;;  %v963_v30 = vsel %vm961_vm3, %v947_v29, 0 }
  0x1a   : > { %972 = vmatpush.bf16.msra.mxu1 %v963_v30 }
  0x1c   : > { %737 = vmatpush.bf16.msra.mxu0 %v2239_v8 }
  0x1f   : > { %2183 = vmatmul.msk.bf16.vlgmr.msra.gmra.mxu0 %vm710_vm2, %v691_v11 }
  0x2f   : > { %2184 = vmatmul.msk.bf16.gmra.mxu0 %vm710_vm2, %v692_v14 }
  0x3f   : > { %2185 = vmatmul.msk.bf16.gmra.mxu0 %vm710_vm2, %v693_v17 }
  0x4f   : > { %2186 = vmatmul.msk.bf16.gmra.mxu0 %vm710_vm2, %v694_v20 }
  0x9c   : > { %v739_v23 = vpop.f32.mrf.mxu0 }
  0x9d   : > { %v763_v24 = vmul.f32 %v2551_v21, %v739_v23 }
  0x9f   : > { %v2560_v25 = vadd.f32 %v2556_v22, %v763_v24 }
  0xa1   : > { %v2187_v26 = vmul.f32 -1.442695, %v2560_v25 }
  0xa3   : > { %2261 = vpow2.f32 %v2187_v26 }
  0xa4   : > { %v741_v27 = vpop.f32.mrf.mxu0 }
  0xa5   : > { %v764_v28 = vmul.f32 %v2551_v21, %v741_v27 }
  0xa7   : > { %v2569_v31 = vadd.f32 %v2556_v22, %v764_v28 }
  0xa9   : > { %v2262_v32 = vpop.eup %2261  ;;  %v2188_v33 = vmul.f32 -1.442695, %v2569_v31 }
  0xaa   : > { %v807_v34 = vadd.f32 1.0, %v2262_v32 }
  0xab   : > { %2263 = vpow2.f32 %v2188_v33 }
  0xac   : > { %2265 = vrcp.f32 %v807_v34  ;;  %v744_v35 = vpop.f32.mrf.mxu0  ;;  %v826_v54 = vand.u32 2147483648, %v807_v34  ;;  %vm820_vm5 = vweird.f32 %v807_v34  ;;  %v824_v56 = vand.u32 2147483647, %v807_v34 }
  0xad   : > { %v765_v36 = vmul.f32 %v2551_v21, %v744_v35 }
  0xae   : > { %v827_v0 = vor.u32 1.1754944e-38, %v826_v54  ;;  %vm825_vm8 = vcmp.eq.f32.partialorder %v824_v56, 8.507059e+37 }
  0xaf   : > { %v2574_v37 = vadd.f32 %v2556_v22, %v765_v36 }
  0xb1   : > { %v2264_v38 = vpop.eup %2263  ;;  %v2189_v39 = vmul.f32 -1.442695, %v2574_v37 }
  0xb2   : > { %v2266_v40 = vpop.eup %2265  ;;  %v808_v41 = vadd.f32 1.0, %v2264_v38 }
  0xb3   : > { %v816_v42 = vmul.f32 %v2266_v40, %v807_v34  ;;  %2267 = vpow2.f32 %v2189_v39  ;;  %vm821_vm4 = vweird.f32 %v2266_v40 }
  0xb4   : > { %2269 = vrcp.f32 %v808_v41  ;;  %v746_v43 = vpop.f32.mrf.mxu0  ;;  %vm822_vm6 = vmor %vm820_vm5, %vm821_vm4  ;;  %v839_v59 = vand.u32 2147483647, %v808_v41  ;;  %v841_v60 = vand.u32 2147483648, %v808_v41  ;;  %vm835_vm9 = vweird.f32 %v808_v41 }
  0xb5   : > { %v817_v44 = vsub.f32 1.0, %v816_v42  ;;  %v766_v45 = vmul.f32 %v2551_v21, %v746_v43 }
  0xb6   : > { %v842_v6 = vor.u32 1.1754944e-38, %v841_v60  ;;  %vm840_vm11 = vcmp.eq.f32.partialorder %v839_v59, 8.507059e+37 }
  0xb7   : > { %v818_v46 = vmul.f32 %v2266_v40, %v817_v44  ;;  %v2579_v47 = vadd.f32 %v2556_v22, %v766_v45 }
  0xb9   : > { %v2268_v48 = vpop.eup %2267  ;;  %v2190_v49 = vmul.f32 -1.442695, %v2579_v47  ;;  %v819_v52 = vadd.f32 %v2266_v40, %v818_v46 }
  0xba   : > { %v2270_v50 = vpop.eup %2269  ;;  %v2582_v51 = vadd.f32 1.0, %v2268_v48 }
  0xbb   : > { %v831_v53 = vmul.f32 %v2270_v50, %v808_v41  ;;  %2271 = vpow2.f32 %v2190_v49  ;;  %v823_v61 = vsel %vm822_vm6, %v2266_v40, %v819_v52  ;;  %vm836_vm7 = vweird.f32 %v2270_v50 }
  0xbc   : > { %2273 = vrcp.f32 %v2582_v51  ;;  %v749_v55 = vpop.f32.mrf.mxu0  ;;  %v828_v5 = vsel %vm825_vm8, %v827_v0, %v823_v61  ;;  %vm837_vm10 = vmor %vm835_vm9, %vm836_vm7  ;;  %v856_v27 = vand.u32 2147483648, %v2582_v51  ;;  %vm850_vm14 = vweird.f32 %v2582_v51 }
  0xbd   : > { %v832_v57 = vsub.f32 1.0, %v831_v53  ;;  %v767_v58 = vmul.f32 %v2551_v21, %v749_v55  ;;  %v2592_v12 = vmul.f32 %v828_v5, %v2560_v25  ;;  %v854_v29 = vand.u32 2147483647, %v2582_v51 }
  0xbe   : > { %v857_v38 = vor.u32 1.1754944e-38, %v856_v27 }
  0xbf   : > { %v833_v62 = vmul.f32 %v2270_v50, %v832_v57  ;;  %v2587_v63 = vadd.f32 %v2556_v22, %v767_v58  ;;  %vm855_vm1 = vcmp.eq.f32.partialorder %v854_v29, 8.507059e+37 }
  0xc1   : > { %v2272_v1 = vpop.eup %2271  ;;  %v834_v2 = vadd.f32 %v2270_v50, %v833_v62  ;;  %v2191_v3 = vmul.f32 -1.442695, %v2587_v63 }
  0xc2   : > { %v2274_v4 = vpop.eup %2273  ;;  %v810_v7 = vadd.f32 1.0, %v2272_v1 }
  0xc3   : > { %v838_v8 = vsel %vm837_vm10, %v2270_v50, %v834_v2  ;;  %v846_v9 = vmul.f32 %v2274_v4, %v2582_v51  ;;  %2275 = vpow2.f32 %v2191_v3  ;;  %vm851_vm13 = vweird.f32 %v2274_v4 }
  0xc4   : > { %v843_v10 = vsel %vm840_vm11, %v842_v6, %v838_v8  ;;  %2277 = vrcp.f32 %v810_v7  ;;  %v751_v11 = vpop.f32.mrf.mxu0  ;;  %vm852_vm15 = vmor %vm850_vm14, %vm851_vm13  ;;  %v869_v32 = vand.u32 2147483647, %v810_v7  ;;  %v871_v33 = vand.u32 2147483648, %v810_v7 }
  0xc5   : > { %v2595_v13 = vmul.f32 %v843_v10, %v2569_v31  ;;  %v847_v14 = vsub.f32 1.0, %v846_v9  ;;  %v768_v15 = vmul.f32 %v2551_v21, %v751_v11  ;;  %vm865_vm2 = vweird.f32 %v810_v7 }
  0xc6   : > { %v872_v44 = vor.u32 1.1754944e-38, %v871_v33  ;;  %vm870_vm5 = vcmp.eq.f32.partialorder %v869_v32, 8.507059e+37 }
  0xc7   : > { %v848_v16 = vmul.f32 %v2274_v4, %v847_v14  ;;  %v2599_v17 = vadd.f32 %v2556_v22, %v768_v15  ;;  %v943_v18 = vpack.c.bf16 %v2595_v13, %v2592_v12 }
  0xc9   : > { %v2276_v19 = vpop.eup %2275  ;;  %v2192_v20 = vmul.f32 -1.442695, %v2599_v17  ;;  %2195 = vmatmul.msk.bf16.vlgmr.msra.gmra.mxu1 %vm3485_vm12, %v943_v18  ;;  %v849_v25 = vadd.f32 %v2274_v4, %v848_v16 }
  0xca   : > { %v2278_v23 = vpop.eup %2277  ;;  %v2605_v24 = vadd.f32 1.0, %v2276_v19 }
  0xcb   : > { %v861_v26 = vmul.f32 %v2278_v23, %v810_v7  ;;  %2279 = vpow2.f32 %v2192_v20  ;;  %v853_v34 = vsel %vm852_vm15, %v2274_v4, %v849_v25  ;;  %vm866_vm0 = vweird.f32 %v2278_v23 }
  0xcc   : > { %2281 = vrcp.f32 %v2605_v24  ;;  %v754_v28 = vpop.f32.mrf.mxu0  ;;  %v858_v43 = vsel %vm855_vm1, %v857_v38, %v853_v34  ;;  %vm867_vm4 = vmor %vm865_vm2, %vm866_vm0  ;;  %vm880_vm7 = vweird.f32 %v2605_v24 }
  0xcd   : > { %v862_v30 = vsub.f32 1.0, %v861_v26  ;;  %v769_v31 = vmul.f32 %v2551_v21, %v754_v28  ;;  %v2618_v51 = vmul.f32 %v858_v43, %v2574_v37  ;;  %v2655_v43 = vld [vmem:[%s3498_s2] ss:$0 sm:$0xff] }
  0xcf   : > { %v863_v35 = vmul.f32 %v2278_v23, %v862_v30  ;;  %v2613_v36 = vadd.f32 %v2556_v22, %v769_v31 }
  0xd1   : > { %v2280_v39 = vpop.eup %2279  ;;  %v864_v40 = vadd.f32 %v2278_v23, %v863_v35  ;;  %v2193_v41 = vmul.f32 -1.442695, %v2613_v36 }
  0xd2   : > { %v2282_v42 = vpop.eup %2281  ;;  %v812_v45 = vadd.f32 1.0, %v2280_v39 }
  0xd3   : > { %v868_v46 = vsel %vm867_vm4, %v2278_v23, %v864_v40  ;;  %v876_v48 = vmul.f32 %v2282_v42, %v2605_v24  ;;  %2283 = vpow2.f32 %v2193_v41  ;;  %vm881_vm6 = vweird.f32 %v2282_v42 }
  0xd4   : > { %v873_v49 = vsel %vm870_vm5, %v872_v44, %v868_v46  ;;  %2285 = vrcp.f32 %v812_v45  ;;  %v756_v50 = vpop.f32.mrf.mxu0  ;;  %vm882_vm8 = vmor %vm880_vm7, %vm881_vm6  ;;  %v901_v0 = vand.u32 2147483648, %v812_v45  ;;  %v899_v3 = vand.u32 2147483647, %v812_v45  ;;  %v2660_v44 = vld [vmem:[%s3499_s28] ss:$0 sm:$0xff] }
  0xd5   : > { %v2621_v52 = vmul.f32 %v873_v49, %v2579_v47  ;;  %v877_v53 = vsub.f32 1.0, %v876_v48  ;;  %v770_v54 = vmul.f32 %v2551_v21, %v756_v50  ;;  %v886_v21 = vand.u32 2147483648, %v2605_v24 }
  0xd6   : > { %vm895_vm11 = vweird.f32 %v812_v45  ;;  %v902_v9 = vor.u32 1.1754944e-38, %v901_v0  ;;  %vm900_vm14 = vcmp.eq.f32.partialorder %v899_v3, 8.507059e+37 }
  0xd7   : > { %v878_v55 = vmul.f32 %v2282_v42, %v877_v53  ;;  %v2625_v56 = vadd.f32 %v2556_v22, %v770_v54  ;;  %v944_v57 = vpack.c.bf16 %v2621_v52, %v2618_v51  ;;  %v884_v22 = vand.u32 2147483647, %v2605_v24 }
  0xd8   : > { %v887_v4 = vor.u32 1.1754944e-38, %v886_v21 }
  0xd9   : > { %v2284_v58 = vpop.eup %2283  ;;  %v2194_v59 = vmul.f32 -1.442695, %v2625_v56  ;;  %2196 = vmatmul.msk.bf16.gmra.mxu1 %vm3485_vm12, %v944_v57  ;;  %v879_v61 = vadd.f32 %v2282_v42, %v878_v55  ;;  %vm885_vm10 = vcmp.eq.f32.partialorder %v884_v22, 8.507059e+37 }
  0xda   : > { %v2286_v37 = vpop.eup %2285  ;;  %v813_v60 = vadd.f32 1.0, %v2284_v58 }
  0xdb   : > { %v891_v47 = vmul.f32 %v2286_v37, %v812_v45  ;;  %2287 = vpow2.f32 %v2194_v59  ;;  %v883_v1 = vsel %vm882_vm8, %v2282_v42, %v879_v61  ;;  %vm896_vm9 = vweird.f32 %v2286_v37 }
  0xdc   : > { %2289 = vrcp.f32 %v813_v60  ;;  %v888_v8 = vsel %vm885_vm10, %v887_v4, %v883_v1  ;;  %vm897_vm13 = vmor %vm895_vm11, %vm896_vm9  ;;  %v916_v27 = vand.u32 2147483648, %v813_v60  ;;  %vm910_vm0 = vweird.f32 %v813_v60 }
  0xdd   : > { %v892_v62 = vsub.f32 1.0, %v891_v47  ;;  %v2635_v16 = vmul.f32 %v888_v8, %v2587_v63  ;;  %v914_v28 = vand.u32 2147483647, %v813_v60  ;;  %vm1180_vm8 = vcmask 254976  }
  0xde   : > { %v917_v32 = vor.u32 1.1754944e-38, %v916_v27  ;;  %vm1178_vm9 = vcmask 261120   ;;  %v2406_v45 = vmov 0.0  }
  0xdf   : > { %v893_v2 = vmul.f32 %v2286_v37, %v892_v62  ;;  %vm915_vm4 = vcmp.eq.f32.partialorder %v914_v28, 8.507059e+37  ;;  %1181 = vst.msk [vmem:[#allocation2 + $0x8] sm:$0x3] %vm1180_vm8, %v2406_v45 }
  0xe0   : > { %1182 = vst.msk [vmem:[#allocation2 + $0x10] sm:$0xff] %vm1178_vm9, %v2406_v45 }
  0xe1   : > { %v2288_v5 = vpop.eup %2287  ;;  %v894_v6 = vadd.f32 %v2286_v37, %v893_v2  ;;  %1183 = vst.msk [vmem:[#allocation2 + $0x18] sm:$0x3] %vm1180_vm8, %v2406_v45 }
  0xe2   : > { %v2290_v7 = vpop.eup %2289  ;;  %v814_v10 = vadd.f32 1.0, %v2288_v5  ;;  %1179 = vst.msk [vmem:[#allocation2] sm:$0xff] %vm1178_vm9, %v2406_v45  ;;  %v1209_v5 = vld [vmem:[%s3468_s7] sm:$0x7] }
  0xe3   : > { %v898_v11 = vsel %vm897_vm13, %v2286_v37, %v894_v6  ;;  %v906_v14 = vmul.f32 %v2290_v7, %v813_v60  ;;  %vm911_vm15 = vweird.f32 %v2290_v7  ;;  %1184 = vst.msk [vmem:[#allocation2 + $0x20] sm:$0xff] %vm1178_vm9, %v2406_v45 }
  0xe4   : > { %v903_v15 = vsel %vm900_vm14, %v902_v9, %v898_v11  ;;  %2291 = vrcp.f32 %v814_v10  ;;  %vm912_vm1 = vmor %vm910_vm0, %vm911_vm15  ;;  %v931_v63 = vand.u32 2147483648, %v814_v10  ;;  %v929_v31 = vand.u32 2147483647, %v814_v10  ;;  %1185 = vst.msk [vmem:[#allocation2 + $0x28] sm:$0x3] %vm1180_vm8, %v2406_v45 }
  0xe5   : > { %v2638_v18 = vmul.f32 %v903_v15, %v2599_v17  ;;  %v907_v19 = vsub.f32 1.0, %v906_v14  ;;  %vm925_vm5 = vweird.f32 %v814_v10  ;;  %1186 = vst.msk [vmem:[#allocation2 + $0x30] sm:$0xff] %vm1178_vm9, %v2406_v45  ;;  %v2705_v14 = vperm.slane %v1209_v5, 0 }
  0xe6   : > { %v932_v35 = vor.u32 1.1754944e-38, %v931_v63  ;;  %vm930_vm7 = vcmp.eq.f32.partialorder %v929_v31, 8.507059e+37  ;;  %1187 = vst.msk [vmem:[#allocation2 + $0x38] sm:$0x3] %vm1180_vm8, %v2406_v45  ;;  %v2707_v15 = vperm.slane %v1209_v5, 1 }
  0xe7   : > { %v908_v20 = vmul.f32 %v2290_v7, %v907_v19  ;;  %v945_v23 = vpack.c.bf16 %v2638_v18, %v2635_v16  ;;  %1188 = vst.msk [vmem:[#allocation2 + $0x40] sm:$0xff] %vm1178_vm9, %v2406_v45 }
  0xe8   : > { %1189 = vst.msk [vmem:[#allocation2 + $0x48] sm:$0x3] %vm1180_vm8, %v2406_v45 }
  0xe9   : > { %2197 = vmatmul.msk.bf16.gmra.mxu1 %vm3485_vm12, %v945_v23  ;;  %v909_v25 = vadd.f32 %v2290_v7, %v908_v20  ;;  %1190 = vst.msk [vmem:[#allocation2 + $0x50] sm:$0xff] %vm1178_vm9, %v2406_v45 }
  0xea   : > { %v2292_v24 = vpop.eup %2291  ;;  %1191 = vst.msk [vmem:[#allocation2 + $0x58] sm:$0x3] %vm1180_vm8, %v2406_v45 }
  0xeb   : > { %v921_v26 = vmul.f32 %v2292_v24, %v814_v10  ;;  %v913_v30 = vsel %vm912_vm1, %v2290_v7, %v909_v25  ;;  %vm926_vm2 = vweird.f32 %v2292_v24  ;;  %1192 = vst.msk [vmem:[#allocation2 + $0x60] sm:$0xff] %vm1178_vm9, %v2406_v45  ;;  %v1237_v25 = vld [vmem:[#allocation2 + $0x1] sm:$0xff] }
  0xec   : > { %v918_v34 = vsel %vm915_vm4, %v917_v32, %v913_v30  ;;  %vm927_vm6 = vmor %vm925_vm5, %vm926_vm2  ;;  %1193 = vst.msk [vmem:[#allocation2 + $0x68] sm:$0x3] %vm1180_vm8, %v2406_v45  ;;  %v1210_v30 = vld [vmem:[%s3468_s7 + $0x4] sm:$0x7] }
  0xed   : > { %v922_v29 = vsub.f32 1.0, %v921_v26  ;;  %v2644_v40 = vmul.f32 %v918_v34, %v2613_v36  ;;  %1194 = vst.msk [vmem:[#allocation2 + $0x70] sm:$0xff] %vm1178_vm9, %v2406_v45 }
  0xee   : > { %1195 = vst.msk [vmem:[#allocation2 + $0x78] sm:$0x3] %vm1180_vm8, %v2406_v45 }
  0xef   : > { %v923_v17 = vmul.f32 %v2292_v24, %v922_v29  ;;  %1196 = vst.msk [vmem:[#allocation2 + $0x80] sm:$0xff] %vm1178_vm9, %v2406_v45 }
  0xf0   : > { %1197 = vst.msk [vmem:[#allocation2 + $0x88] sm:$0x3] %vm1180_vm8, %v2406_v45 }
  0xf1   : > { %v924_v33 = vadd.f32 %v2292_v24, %v923_v17  ;;  %1198 = vst.msk [vmem:[#allocation2 + $0x90] sm:$0xff] %vm1178_vm9, %v2406_v45  ;;  %v2717_v17 = vperm.slane %v1209_v5, 2 }
  0xf2   : > { %1199 = vst.msk [vmem:[#allocation2 + $0x98] sm:$0x3] %vm1180_vm8, %v2406_v45 }
  0xf3   : > { %v928_v38 = vsel %vm927_vm6, %v2292_v24, %v924_v33  ;;  %v1212_v24 = vld [vmem:[#allocation2] sm:$0xff]  ;;  %v1246_v33 = vmul.f32 %v2707_v15, %v1237_v25 }
  0xf4   : > { %v933_v39 = vsel %vm930_vm7, %v932_v35, %v928_v38  ;;  %v1221_v32 = vmul.f32 %v2705_v14, %v1212_v24 }
  0xf5   : > { %v2647_v41 = vmul.f32 %v933_v39, %v2625_v56  ;;  %v1262_v39 = vld [vmem:[#allocation2 + $0x2] sm:$0xff] }
  0xf7   : > { %v946_v42 = vpack.c.bf16 %v2647_v41, %v2644_v40 }
  0xf9   : > { %2198 = vmatmul.msk.bf16.gmra.mxu1 %vm3485_vm12, %v946_v42 }
 0x146   : > { %v974_v36 = vpop.f32.mrf.mxu1 }
 0x147   : > { %v998_v46 = vmul.f32 %v2655_v43, %v974_v36  ;;  %v2725_v36 = vperm.slane %v1210_v30, 0 }
 0x149   : > { %v2667_v48 = vadd.f32 %v2660_v44, %v998_v46 }
 0x14b   : > { %v2199_v49 = vmul.f32 -1.442695, %v2667_v48 }
 0x14d   : > { %2293 = vpow2.f32 %v2199_v49 }
 0x14e   : > { %v976_v50 = vpop.f32.mrf.mxu1 }
 0x14f   : > { %v999_v53 = vmul.f32 %v2655_v43, %v976_v50 }
 0x151   : > { %v2681_v54 = vadd.f32 %v2660_v44, %v999_v53  ;;  %v1254_v53 = vadd.f32 %v1246_v33, %v1221_v32 }
 0x153   : > { %v2294_v55 = vpop.eup %2293  ;;  %v2200_v56 = vmul.f32 -1.442695, %v2681_v54 }
 0x154   : > { %v1042_v57 = vadd.f32 1.0, %v2294_v55  ;;  %v1271_v55 = vmul.f32 %v2717_v17, %v1262_v39 }
 0x155   : > { %2295 = vpow2.f32 %v2200_v56 }
 0x156   : > { %2297 = vrcp.f32 %v1042_v57  ;;  %v979_v58 = vpop.f32.mrf.mxu1  ;;  %v1061_v2 = vand.u32 2147483648, %v1042_v57  ;;  %v1059_v4 = vand.u32 2147483647, %v1042_v57  ;;  %vm1055_vm11 = vweird.f32 %v1042_v57 }
 0x157   : > { %v1000_v59 = vmul.f32 %v2655_v43, %v979_v58  ;;  %v1211_v58 = vld [vmem:[%s3468_s7 + $0x8] sm:$0x7] }
 0x158   : > { %v1062_v11 = vor.u32 1.1754944e-38, %v1061_v2  ;;  %vm1060_vm14 = vcmp.eq.f32.partialorder %v1059_v4, 8.507059e+37  ;;  %v2740_v2 = vperm.slane %v1210_v30, 2 }
 0x159   : > { %v2694_v37 = vadd.f32 %v2660_v44, %v1000_v59 }
 0x15b   : > { %v2296_v60 = vpop.eup %2295  ;;  %v2201_v61 = vmul.f32 -1.442695, %v2694_v37 }
 0x15c   : > { %v2298_v47 = vpop.eup %2297  ;;  %v1043_v21 = vadd.f32 1.0, %v2296_v60 }
 0x15d   : > { %v1051_v22 = vmul.f32 %v2298_v47, %v1042_v57  ;;  %2299 = vpow2.f32 %v2201_v61  ;;  %vm1056_vm10 = vweird.f32 %v2298_v47 }
 0x15e   : > { %2301 = vrcp.f32 %v1043_v21  ;;  %v981_v62 = vpop.f32.mrf.mxu1  ;;  %vm1057_vm13 = vmor %vm1055_vm11, %vm1056_vm10  ;;  %v1076_v31 = vand.u32 2147483648, %v1043_v21  ;;  %v1074_v35 = vand.u32 2147483647, %v1043_v21  ;;  %vm1070_vm0 = vweird.f32 %v1043_v21 }
 0x15f   : > { %v1052_v0 = vsub.f32 1.0, %v1051_v22  ;;  %v1001_v1 = vmul.f32 %v2655_v43, %v981_v62 }
 0x160   : > { %v1077_v49 = vor.u32 1.1754944e-38, %v1076_v31  ;;  %vm1075_vm2 = vcmp.eq.f32.partialorder %v1074_v35, 8.507059e+37 }
 0x161   : > { %v1053_v3 = vmul.f32 %v2298_v47, %v1052_v0  ;;  %v2702_v6 = vadd.f32 %v2660_v44, %v1001_v1  ;;  %v1279_v0 = vadd.f32 %v1271_v55, %v1254_v53  ;;  %v2738_v1 = vperm.slane %v1210_v30, 1 }
 0x163   : > { %v2300_v7 = vpop.eup %2299  ;;  %v1054_v8 = vadd.f32 %v2298_v47, %v1053_v3  ;;  %v2202_v9 = vmul.f32 -1.442695, %v2702_v6  ;;  %v2742_v3 = vperm.slane %v1211_v58, 0 }
 0x164   : > { %v2302_v10 = vpop.eup %2301  ;;  %v2709_v19 = vadd.f32 1.0, %v2300_v7  ;;  %v2748_v7 = vperm.slane %v1211_v58, 1 }
 0x165   : > { %v1058_v20 = vsel %vm1057_vm13, %v2298_v47, %v1054_v8  ;;  %v1066_v23 = vmul.f32 %v2302_v10, %v1043_v21  ;;  %2303 = vpow2.f32 %v2202_v9  ;;  %vm1071_vm15 = vweird.f32 %v2302_v10 }
 0x166   : > { %v1063_v26 = vsel %vm1060_vm14, %v1062_v11, %v1058_v20  ;;  %2305 = vrcp.f32 %v2709_v19  ;;  %v984_v27 = vpop.f32.mrf.mxu1  ;;  %vm1072_vm1 = vmor %vm1070_vm0, %vm1071_vm15  ;;  %v1089_v5 = vand.u32 2147483647, %v2709_v19  ;;  %vm1085_vm5 = vweird.f32 %v2709_v19 }
 0x167   : > { %v1170_v28 = vmul.f32 %v1063_v26, %v2667_v48  ;;  %v1067_v29 = vsub.f32 1.0, %v1066_v23  ;;  %v1002_v63 = vmul.f32 %v2655_v43, %v984_v27 }
 0x168   : > { %vm1090_vm7 = vcmp.eq.f32.partialorder %v1089_v5, 8.507059e+37 }
 0x169   : > { %1201 = vst.msk [vmem:[#allocation2 + $0x11] sm:$0xff] %vm1178_vm9, %v1170_v28  ;;  %v1068_v34 = vmul.f32 %v2302_v10, %v1067_v29  ;;  %v2723_v38 = vadd.f32 %v2660_v44, %v1002_v63 }
 0x16b   : > { %v2304_v42 = vpop.eup %2303  ;;  %v1069_v45 = vadd.f32 %v2302_v10, %v1068_v34  ;;  %v2203_v46 = vmul.f32 -1.442695, %v2723_v38 }
 0x16c   : > { %v2306_v48 = vpop.eup %2305  ;;  %v2728_v50 = vadd.f32 1.0, %v2304_v42 }
 0x16d   : > { %v1073_v56 = vsel %vm1072_vm1, %v2302_v10, %v1069_v45  ;;  %v1081_v57 = vmul.f32 %v2306_v48, %v2709_v19  ;;  %2307 = vpow2.f32 %v2203_v46  ;;  %vm1086_vm4 = vweird.f32 %v2306_v48 }
 0x16e   : > { %v1078_v59 = vsel %vm1075_vm2, %v1077_v49, %v1073_v56  ;;  %2309 = vrcp.f32 %v2728_v50  ;;  %v986_v60 = vpop.f32.mrf.mxu1  ;;  %v2753_v10 = vperm.slane %v1211_v58, 2  ;;  %v1104_v24 = vand.u32 2147483647, %v2728_v50  ;;  %vm1087_vm6 = vmor %vm1085_vm5, %vm1086_vm4 }
 0x16f   : > { %v1171_v61 = vmul.f32 %v1078_v59, %v2681_v54  ;;  %v1082_v47 = vsub.f32 1.0, %v1081_v57  ;;  %v1003_v21 = vmul.f32 %v2655_v43, %v986_v60  ;;  %v1091_v54 = vand.u32 2147483648, %v2709_v19 }
 0x170   : > { %v1213_v22 = vld [vmem:[#allocation2 + $0x10] sm:$0xff]  ;;  %vm1100_vm8 = vweird.f32 %v2728_v50  ;;  %v1106_v19 = vand.u32 2147483648, %v2728_v50  ;;  %vm2768_vm10 = vcmp.eq.f32.partialorder %v1104_v24, 8.507059e+37 }
 0x171   : > { %v1238_v62 = vld [vmem:[#allocation2 + $0x11] sm:$0xff]  ;;  %v1296_v4 = vmul.f32 %v2725_v36, %v1213_v22  ;;  %1202 = vst.msk [vmem:[#allocation2 + $0x21] sm:$0xff] %vm1178_vm9, %v1171_v61  ;;  %v1083_v8 = vmul.f32 %v2306_v48, %v1082_v47  ;;  %v2751_v9 = vadd.f32 %v2660_v44, %v1003_v21  ;;  %v1222_v20 = vmul.f32 %v2705_v14, %v1213_v22 }
 0x172   : > { %v1247_v23 = vmul.f32 %v2707_v15, %v1238_v62  ;;  %v1092_v63 = vor.u32 1.1754944e-38, %v1091_v54  ;;  %v1263_v31 = vld [vmem:[#allocation2 + $0x12] sm:$0xff]  ;;  %v1321_v34 = vmul.f32 %v2738_v1, %v1238_v62  ;;  %v1107_v62 = vor.u32 1.1754944e-38, %v1106_v19 }
 0x173   : > { %v2308_v11 = vpop.eup %2307  ;;  %v1084_v26 = vadd.f32 %v2306_v48, %v1083_v8  ;;  %v2204_v28 = vmul.f32 -1.442695, %v2751_v9  ;;  %v1304_v29 = vadd.f32 %v1296_v4, %v1279_v0  ;;  %v1272_v56 = vmul.f32 %v2717_v17, %v1263_v31 }
 0x174   : > { %v2310_v25 = vpop.eup %2309  ;;  %v2759_v27 = vadd.f32 1.0, %v2308_v11  ;;  %v1255_v35 = vadd.f32 %v1247_v23, %v1222_v20  ;;  %v1346_v47 = vmul.f32 %v2740_v2, %v1263_v31 }
 0x175   : > { %v1096_v30 = vmul.f32 %v2310_v25, %v2728_v50  ;;  %v1088_v32 = vsel %vm1087_vm6, %v2306_v48, %v1084_v26  ;;  %v1329_v55 = vadd.f32 %v1321_v34, %v1304_v29  ;;  %vm1101_vm11 = vweird.f32 %v2310_v25 }
 0x176   : > { %2311 = vrcp.f32 %v2759_v27  ;;  %v989_v33 = vpop.f32.mrf.mxu1  ;;  %v1093_v39 = vsel %vm1090_vm7, %v1092_v63, %v1088_v32  ;;  %v1119_v58 = vand.u32 2147483647, %v2759_v27  ;;  %v1121_v59 = vand.u32 2147483648, %v2759_v27  ;;  %vm1102_vm14 = vmor %vm1100_vm8, %vm1101_vm11 }
 0x177   : > { %v1097_v42 = vsub.f32 1.0, %v1096_v30  ;;  %2313 = vpow2.f32 %v2204_v28  ;;  %v1172_v49 = vmul.f32 %v1093_v39, %v2694_v37  ;;  %v1004_v48 = vmul.f32 %v2655_v43, %v989_v33 }
 0x178   : > { %v1214_v45 = vld [vmem:[#allocation2 + $0x20] sm:$0xff]  ;;  %v1280_v0 = vadd.f32 %v1272_v56, %v1255_v35  ;;  %vm1115_vm13 = vweird.f32 %v2759_v27  ;;  %v1354_v8 = vadd.f32 %v1346_v47, %v1329_v55  ;;  %vm2790_vm15 = vcmp.eq.f32.partialorder %v1119_v58, 8.507059e+37  ;;  %v1646_v55 = vld [vmem:[%s3471_s10 + $0x10] sm:$0xff] }
 0x179   : > { %v1239_v46 = vld [vmem:[#allocation2 + $0x21] sm:$0xff]  ;;  %v1297_v57 = vmul.f32 %v2725_v36, %v1214_v45  ;;  %1203 = vst.msk [vmem:[#allocation2 + $0x31] sm:$0xff] %vm1178_vm9, %v1172_v49  ;;  %v1098_v61 = vmul.f32 %v2310_v25, %v1097_v42  ;;  %v2779_v37 = vadd.f32 %v2660_v44, %v1004_v48  ;;  %v1223_v21 = vmul.f32 %v2705_v14, %v1214_v45 }
 0x17a   : > { %v1264_v60 = vld [vmem:[#allocation2 + $0x22] sm:$0xff]  ;;  %v1248_v22 = vmul.f32 %v2707_v15, %v1239_v46  ;;  %v1122_v26 = vor.u32 1.1754944e-38, %v1121_v59  ;;  %v1372_v31 = vmul.f32 %v2742_v3, %v1214_v45  ;;  %v1322_v35 = vmul.f32 %v2738_v1, %v1239_v46 }
 0x17b   : > { %v1099_v5 = vadd.f32 %v2310_v25, %v1098_v61  ;;  %v2205_v54 = vmul.f32 -1.442695, %v2779_v37  ;;  %v1273_v20 = vmul.f32 %v2717_v17, %v1264_v60  ;;  %v1305_v28 = vadd.f32 %v1297_v57, %v1280_v0 }
 0x17c   : > { %v2312_v4 = vpop.eup %2311  ;;  %v1256_v33 = vadd.f32 %v1248_v22, %v1223_v21  ;;  %v1397_v53 = vmul.f32 %v2748_v7, %v1239_v46  ;;  %v1380_v57 = vadd.f32 %v1372_v31, %v1354_v8  ;;  %v1422_v59 = vmul.f32 %v2753_v10, %v1264_v60 }
 0x17d   : > { %v2314_v11 = vpop.eup %2313  ;;  %v1111_v23 = vmul.f32 %v2312_v4, %v2759_v27  ;;  %v1103_v29 = vsel %vm1102_vm14, %v2310_v25, %v1099_v5  ;;  %2315 = vpow2.f32 %v2205_v54  ;;  %v1347_v25 = vmul.f32 %v2740_v2, %v1264_v60 }
 0x17e   : > { %v2794_v63 = vadd.f32 1.0, %v2314_v11  ;;  %v991_v30 = vpop.f32.mrf.mxu1  ;;  %v1108_v32 = vsel %vm2768_vm10, %v1107_v62, %v1103_v29  ;;  %vm1116_vm0 = vweird.f32 %v2312_v4  ;;  %v1330_v56 = vadd.f32 %v1322_v35, %v1305_v28  ;;  %v1645_v62 = vld [vmem:[%s3471_s10 + $0x8] sm:$0xff] }
 0x17f   : > { %v1112_v50 = vsub.f32 1.0, %v1111_v23  ;;  %v1005_v19 = vmul.f32 %v2655_v43, %v991_v30  ;;  %v1173_v34 = vmul.f32 %v1108_v32, %v2702_v6  ;;  %v1647_v6 = vld [vmem:[%s3471_s10 + $0x18] sm:$0xff]  ;;  %v1281_v46 = vadd.f32 %v1273_v20, %v1256_v33  ;;  %vm1117_vm1 = vmor %vm1115_vm13, %vm1116_vm0  ;;  %v1644_v20 = vld [vmem:[%s3471_s10] sm:$0xff] }
 0x180   : > { %2317 = vrcp.f32 %v2794_v63  ;;  %v1215_v39 = vld [vmem:[#allocation2 + $0x30] sm:$0xff]  ;;  %1664 = vmatpush.msrb.mxu1 %v1647_v6  ;;  %v1134_v21 = vand.u32 2147483647, %v2794_v63  ;;  %v1136_v22 = vand.u32 2147483648, %v2794_v63  ;;  %vm1130_vm2 = vweird.f32 %v2794_v63 }
 0x181   : > { %v1240_v42 = vld [vmem:[#allocation2 + $0x31] sm:$0xff]  ;;  %v1113_v49 = vmul.f32 %v2312_v4, %v1112_v50  ;;  %v2805_v45 = vadd.f32 %v2660_v44, %v1005_v19  ;;  %v1224_v43 = vmul.f32 %v2705_v14, %v1215_v39  ;;  %1204 = vst.msk [vmem:[#allocation2 + $0x41] sm:$0xff] %vm1178_vm9, %v1173_v34  ;;  %v1298_v0 = vmul.f32 %v2725_v36, %v1215_v39 }
 0x182   : > { %v1249_v48 = vmul.f32 %v2707_v15, %v1240_v42  ;;  %v1265_v47 = vld [vmem:[#allocation2 + $0x32] sm:$0xff]  ;;  %v1373_v5 = vmul.f32 %v2742_v3, %v1215_v39  ;;  %1665 = vmatpush.msrb.mxu1 %v1646_v55  ;;  %v1355_v23 = vadd.f32 %v1347_v25, %v1330_v56  ;;  %v1405_v28 = vadd.f32 %v1397_v53, %v1380_v57 }
 0x183   : > { %v1114_v44 = vadd.f32 %v2312_v4, %v1113_v49  ;;  %v2206_v58 = vmul.f32 -1.442695, %v2805_v45  ;;  %v2316_v61 = vpop.eup %2315  ;;  %v1274_v30 = vmul.f32 %v2717_v17, %v1265_v47  ;;  %vm2841_vm4 = vcmp.eq.f32.partialorder %v1134_v21, 8.507059e+37 }
 0x184   : > { %v2829_v60 = vadd.f32 1.0, %v2316_v61  ;;  %v1257_v8 = vadd.f32 %v1249_v48, %v1224_v43  ;;  %1666 = vmatpush.msrb.mxu1 %v1645_v62  ;;  %v1306_v31 = vadd.f32 %v1298_v0, %v1281_v46  ;;  %v1381_v32 = vadd.f32 %v1373_v5, %v1355_v23 }
 0x185   : > { %v1118_v54 = vsel %vm1117_vm1, %v2312_v4, %v1114_v44  ;;  %2319 = vpow2.f32 %v2206_v58  ;;  %v1323_v34 = vmul.f32 %v2738_v1, %v1240_v42  ;;  %v1348_v35 = vmul.f32 %v2740_v2, %v1265_v47 }
 0x186   : > { %v2318_v27 = vpop.eup %2317  ;;  %v1123_v11 = vsel %vm2790_vm15, %v1122_v26, %v1118_v54  ;;  %2321 = vrcp.f32 %v2829_v60  ;;  %v1137_v26 = vor.u32 1.1754944e-38, %v1136_v22  ;;  %1667 = vmatpush.msrb.mxu1 %v1644_v20  ;;  %v1398_v49 = vmul.f32 %v2748_v7, %v1240_v42 }
 0x187   : > { %v1174_v29 = vmul.f32 %v1123_v11, %v2723_v38  ;;  %v1126_v4 = vmul.f32 %v2318_v27, %v2794_v63  ;;  %v1282_v38 = vadd.f32 %v1274_v30, %v1257_v8  ;;  %vm1131_vm5 = vweird.f32 %v2318_v27 }
 0x188   : > { %v1216_v50 = vld [vmem:[#allocation2 + $0x40] sm:$0xff]  ;;  %v1149_v48 = vand.u32 2147483647, %v2829_v60  ;;  %v1151_v6 = vand.u32 2147483648, %v2829_v60  ;;  %vm1145_vm6 = vweird.f32 %v2829_v60  ;;  %v1331_v44 = vadd.f32 %v1323_v34, %v1306_v31  ;;  %vm1132_vm7 = vmor %vm1130_vm2, %vm1131_vm5 }
 0x189   : > { %v1241_v19 = vld [vmem:[#allocation2 + $0x41] sm:$0xff]  ;;  %1205 = vst.msk [vmem:[#allocation2 + $0x51] sm:$0xff] %vm1178_vm9, %v1174_v29  ;;  %v1127_v33 = vsub.f32 1.0, %v1126_v4  ;;  %v1225_v25 = vmul.f32 %v2705_v14, %v1216_v50  ;;  %v1299_v55 = vmul.f32 %v2725_v36, %v1216_v50  ;;  %v2857_v58 = vadd.f32 %v1398_v49, %v1381_v32 }
 0x18a   : > { %v1250_v39 = vmul.f32 %v2707_v15, %v1241_v19  ;;  %v1266_v57 = vld [vmem:[#allocation2 + $0x42] sm:$0xff]  ;;  %v2860_v42 = vmul.f32 %v2753_v10, %v1265_v47  ;;  %v2862_v22 = vadd.f32 %v1422_v59, %v1405_v28  ;;  %v1324_v5 = vmul.f32 %v2738_v1, %v1241_v19 }
 0x18b   : > { %v2320_v53 = vpop.eup %2319  ;;  %v1128_v43 = vmul.f32 %v2318_v27, %v1127_v33  ;;  %v1307_v21 = vadd.f32 %v1299_v55, %v1282_v38  ;;  %vm2870_vm8 = vcmp.eq.f32.partialorder %v1149_v48, 8.507059e+37  ;;  %v1152_v47 = vor.u32 1.1754944e-38, %v1151_v6 }
 0x18c   : > { %v2855_v56 = vadd.f32 1.0, %v2320_v53  ;;  %v2322_v46 = vpop.eup %2321  ;;  %v1258_v0 = vadd.f32 %v1250_v39, %v1225_v25  ;;  %v1275_v59 = vmul.f32 %v2717_v17, %v1266_v57  ;;  %v1374_v28 = vmul.f32 %v2742_v3, %v1216_v50 }
 0x18d   : > { %v1129_v61 = vadd.f32 %v2318_v27, %v1128_v43  ;;  %v1141_v62 = vmul.f32 %v2322_v46, %v2829_v60  ;;  %v1332_v23 = vadd.f32 %v1324_v5, %v1307_v21  ;;  %vm1146_vm10 = vweird.f32 %v2322_v46 }
 0x18e   : > { %2323 = vrcp.f32 %v2855_v56  ;;  %v1356_v30 = vadd.f32 %v1348_v35, %v1331_v44  ;;  %v1164_v32 = vand.u32 2147483647, %v2855_v56  ;;  %v1283_v33 = vadd.f32 %v1275_v59, %v1258_v0  ;;  %vm1147_vm11 = vmor %vm1145_vm6, %vm1146_vm10 }
 0x18f   : > { %v1133_v54 = vsel %vm1132_vm7, %v2318_v27, %v1129_v61  ;;  %v1142_v63 = vsub.f32 1.0, %v1141_v62  ;;  %v1349_v27 = vmul.f32 %v2740_v2, %v1266_v57  ;;  %v1166_v43 = vand.u32 2147483648, %v2855_v56 }
 0x190   : > { %v1138_v11 = vsel %vm2841_vm4, %v1137_v26, %v1133_v54  ;;  %v1217_v20 = vld [vmem:[#allocation2 + $0x50] sm:$0xff]  ;;  %v1382_v49 = vadd.f32 %v1374_v28, %v1356_v30  ;;  %vm1160_vm13 = vweird.f32 %v2855_v56  ;;  %vm2894_vm14 = vcmp.eq.f32.partialorder %v1164_v32, 8.507059e+37 }
 0x191   : > { %v1175_v29 = vmul.f32 %v1138_v11, %v2751_v9  ;;  %v1242_v4 = vld [vmem:[#allocation2 + $0x51] sm:$0xff]  ;;  %v1143_v31 = vmul.f32 %v2322_v46, %v1142_v63  ;;  %v1300_v38 = vmul.f32 %v2725_v36, %v1217_v20  ;;  %v1226_v24 = vmul.f32 %v2705_v14, %v1217_v20 }
 0x192   : > { %v1357_v26 = vadd.f32 %v1349_v27, %v1332_v23  ;;  %v1375_v50 = vmul.f32 %v2742_v3, %v1217_v20  ;;  %v1399_v9 = vmul.f32 %v2748_v7, %v1241_v19  ;;  %v1251_v39 = vmul.f32 %v2707_v15, %v1242_v4  ;;  %v1267_v44 = vld [vmem:[#allocation2 + $0x52] sm:$0xff]  ;;  %v2907_v23 = vld [vmem:[%s3469_s8] ss:$0 sm:$0xff] }
 0x193   : > { %1206 = vst.msk [vmem:[#allocation2 + $0x61] sm:$0xff] %vm1178_vm9, %v1175_v29  ;;  %v1144_v25 = vadd.f32 %v2322_v46, %v1143_v31  ;;  %v1308_v35 = vadd.f32 %v1300_v38, %v1283_v33  ;;  %v1400_v6 = vmul.f32 %v2748_v7, %v1242_v4  ;;  %v1325_v61 = vmul.f32 %v2738_v1, %v1242_v4 }
 0x194   : > { %v2324_v34 = vpop.eup %2323  ;;  %v1383_v48 = vadd.f32 %v1375_v50, %v1357_v26  ;;  %v1407_v62 = vadd.f32 %v1399_v9, %v1382_v49  ;;  %v1259_v54 = vadd.f32 %v1251_v39, %v1226_v24  ;;  %v1167_v63 = vor.u32 1.1754944e-38, %v1166_v43 }
 0x195   : > { %v1156_v53 = vmul.f32 %v2324_v34, %v2855_v56  ;;  %v1148_v55 = vsel %vm1147_vm11, %v2322_v46, %v1144_v25  ;;  %v1333_v59 = vadd.f32 %v1325_v61, %v1308_v35  ;;  %v1424_v46 = vmul.f32 %v2753_v10, %v1266_v57  ;;  %v2927_v25 = vld [vmem:[%s3470_s9] ss:$0 sm:$0xff] }
 0x196   : > { %v1153_v60 = vsel %vm2870_vm8, %v1152_v47, %v1148_v55  ;;  %v1408_v0 = vadd.f32 %v1400_v6, %v1383_v48  ;;  %vm1161_vm15 = vweird.f32 %v2324_v34  ;;  %v1425_v20 = vmul.f32 %v2753_v10, %v1267_v44 }
 0x197   : > { %v1157_v21 = vsub.f32 1.0, %v1156_v53  ;;  %v1176_v5 = vmul.f32 %v1153_v60, %v2779_v37  ;;  %v1276_v37 = vmul.f32 %v2717_v17, %v1267_v44  ;;  %v1350_v28 = vmul.f32 %v2740_v2, %v1267_v44  ;;  %vm1162_vm0 = vmor %vm1160_vm13, %vm1161_vm15 }
 0x198   : > { %v1431_v57 = vadd.f32 %v2860_v42, %v2857_v58  ;;  %v1432_v29 = vadd.f32 %v1424_v46, %v1407_v62  ;;  %v1433_v31 = vadd.f32 %v1425_v20, %v1408_v0  ;;  %v1442_v9 = vmul.f32 %v2907_v23, %v2862_v22 }
 0x199   : > { %v1158_v11 = vmul.f32 %v2324_v34, %v1157_v21  ;;  %1207 = vst.msk [vmem:[#allocation2 + $0x71] sm:$0xff] %vm1178_vm9, %v1176_v5  ;;  %v1284_v32 = vadd.f32 %v1276_v37, %v1259_v54  ;;  %v1358_v38 = vadd.f32 %v1350_v28, %v1333_v59 }
 0x19a   : > { %v1218_v8 = vld [vmem:[#allocation2 + $0x60] sm:$0xff]  ;;  %v1443_v49 = vmul.f32 %v2907_v23, %v1431_v57  ;;  %v1444_v43 = vmul.f32 %v2907_v23, %v1432_v29  ;;  %v1445_v22 = vmul.f32 %v2907_v23, %v1433_v31 }
 0x19b   : > { %v1243_v47 = vld [vmem:[#allocation2 + $0x61] sm:$0xff]  ;;  %v1159_v4 = vadd.f32 %v2324_v34, %v1158_v11  ;;  %v1227_v27 = vmul.f32 %v2705_v14, %v1218_v8  ;;  %v1301_v33 = vmul.f32 %v2725_v36, %v1218_v8  ;;  %v1376_v24 = vmul.f32 %v2742_v3, %v1218_v8 }
 0x19c   : > { %v1252_v30 = vmul.f32 %v2707_v15, %v1243_v47  ;;  %v1268_v58 = vld [vmem:[#allocation2 + $0x62] sm:$0xff]  ;;  %v1326_v42 = vmul.f32 %v2738_v1, %v1243_v47  ;;  %v1401_v53 = vmul.f32 %v2748_v7, %v1243_v47  ;;  %v2944_v21 = vadd.f32 %v2927_v25, %v1443_v49 }
 0x19d   : > { %v1163_v26 = vsel %vm1162_vm0, %v2324_v34, %v1159_v4  ;;  %v1309_v39 = vadd.f32 %v1301_v33, %v1284_v32  ;;  %v1384_v35 = vadd.f32 %v1376_v24, %v1358_v38  ;;  %v1277_v48 = vmul.f32 %v2717_v17, %v1268_v58 }
 0x19e   : > { %v1260_v50 = vadd.f32 %v1252_v30, %v1227_v27  ;;  %v1168_v56 = vsel %vm2894_vm14, %v1167_v63, %v1163_v26  ;;  %v1351_v55 = vmul.f32 %v2740_v2, %v1268_v58  ;;  %v1426_v60 = vmul.f32 %v2753_v10, %v1268_v58 }
 0x19f   : > { %v1177_v34 = vmul.f32 %v1168_v56, %v2805_v45  ;;  %v1334_v6 = vadd.f32 %v1326_v42, %v1309_v39  ;;  %v1409_v61 = vadd.f32 %v1401_v53, %v1384_v35  ;;  %v2941_v45 = vadd.f32 %v2927_v25, %v1442_v9  ;;  %v1370_v9 = vld [vmem:[#allocation2 + $0x90] sm:$0xff] }
 0x1a0   : > { %v1219_v19 = vld [vmem:[#allocation2 + $0x70] sm:$0xff]  ;;  %v1285_v5 = vadd.f32 %v1277_v48, %v1260_v50  ;;  %v2951_v63 = vadd.f32 %v2927_v25, %v1444_v43  ;;  %v2954_v20 = vadd.f32 %v2927_v25, %v1445_v22  ;;  %v2208_v29 = vmul.f32 -1.442695, %v2944_v21 }
 0x1a1   : > { %1208 = vst.msk [vmem:[#allocation2 + $0x81] sm:$0xff] %vm1178_vm9, %v1177_v34  ;;  %v1244_v44 = vld [vmem:[#allocation2 + $0x71] sm:$0xff]  ;;  %v1228_v62 = vmul.f32 %v2705_v14, %v1219_v19  ;;  %v1302_v54 = vmul.f32 %v2725_v36, %v1219_v19  ;;  %v1359_v46 = vadd.f32 %v1351_v55, %v1334_v6  ;;  %v1377_v11 = vmul.f32 %v2742_v3, %v1219_v19 }
 0x1a2   : > { %v1253_v0 = vmul.f32 %v2707_v15, %v1244_v44  ;;  %v1269_v59 = vld [vmem:[#allocation2 + $0x72] sm:$0xff]  ;;  %v1327_v37 = vmul.f32 %v2738_v1, %v1244_v44  ;;  %v1402_v14 = vmul.f32 %v2748_v7, %v1244_v44  ;;  %v1434_v28 = vadd.f32 %v1426_v60, %v1409_v61 }
 0x1a3   : > { %v1310_v47 = vadd.f32 %v1302_v54, %v1285_v5  ;;  %v1385_v15 = vadd.f32 %v1377_v11, %v1359_v46  ;;  %v2207_v57 = vmul.f32 -1.442695, %v2941_v45  ;;  %v1278_v4 = vmul.f32 %v2717_v17, %v1269_v59  ;;  %v1395_v6 = vld [vmem:[#allocation2 + $0x91] sm:$0xff] }
 0x1a4   : > { %v1261_v8 = vadd.f32 %v1253_v0, %v1228_v62  ;;  %v1352_v30 = vmul.f32 %v2740_v2, %v1269_v59  ;;  %v1446_v32 = vmul.f32 %v2907_v23, %v1434_v28  ;;  %v2209_v33 = vmul.f32 -1.442695, %v2951_v63  ;;  %v1420_v0 = vld [vmem:[#allocation2 + $0x92] sm:$0xff] }
 0x1a5   : > { %v1335_v27 = vadd.f32 %v1327_v37, %v1310_v47  ;;  %v1410_v31 = vadd.f32 %v1402_v14, %v1385_v15  ;;  %2325 = vpow2.f32 %v2207_v57  ;;  %v1427_v26 = vmul.f32 %v2753_v10, %v1269_v59 }
 0x1a6   : > { %2327 = vpow2.f32 %v2208_v29  ;;  %v2210_v50 = vmul.f32 -1.442695, %v2954_v20  ;;  %v1286_v58 = vadd.f32 %v1278_v4, %v1261_v8  ;;  %v2970_v34 = vadd.f32 %v2927_v25, %v1446_v32 }
 0x1a7   : > { %v1360_v17 = vadd.f32 %v1352_v30, %v1335_v27  ;;  %v1435_v49 = vadd.f32 %v1427_v26, %v1410_v31  ;;  %2329 = vpow2.f32 %v2209_v33  ;;  %v1379_v48 = vmul.f32 %v2742_v3, %v1370_v9 }
 0x1a8   : > { %v1294_v38 = vld [vmem:[#allocation2 + $0x80] sm:$0xff]  ;;  %2331 = vpow2.f32 %v2210_v50  ;;  %v2211_v55 = vmul.f32 -1.442695, %v2970_v34  ;;  %v1404_v59 = vmul.f32 %v2748_v7, %v1395_v6  ;;  %v1429_v37 = vmul.f32 %v2753_v10, %v1420_v0 }
 0x1a9   : > { %v1319_v24 = vld [vmem:[#allocation2 + $0x81] sm:$0xff]  ;;  %v1303_v42 = vmul.f32 %v2725_v36, %v1294_v38  ;;  %v1378_v56 = vmul.f32 %v2742_v3, %v1294_v38  ;;  %v1447_v36 = vmul.f32 %v2907_v23, %v1435_v49 }
 0x1aa   : > { %v1328_v39 = vmul.f32 %v2738_v1, %v1319_v24  ;;  %v1344_v35 = vld [vmem:[#allocation2 + $0x82] sm:$0xff]  ;;  %v1403_v22 = vmul.f32 %v2748_v7, %v1319_v24  ;;  %2333 = vpow2.f32 %v2211_v55 }
 0x1ab   : > { %v1311_v53 = vadd.f32 %v1303_v42, %v1286_v58  ;;  %v1386_v43 = vadd.f32 %v1378_v56, %v1360_v17  ;;  %v2326_v19 = vpop.eup %2325  ;;  %v1353_v44 = vmul.f32 %v2740_v2, %v1344_v35  ;;  %v1428_v60 = vmul.f32 %v2753_v10, %v1344_v35 }
 0x1ac   : > { %v2328_v62 = vpop.eup %2327  ;;  %v2979_v5 = vadd.f32 %v2927_v25, %v1447_v36  ;;  %v2981_v3 = vadd.f32 1.0, %v2326_v19 }
 0x1ad   : > { %v1336_v1 = vadd.f32 %v1328_v39, %v1311_v53  ;;  %v1411_v61 = vadd.f32 %v1403_v22, %v1386_v43  ;;  %v2984_v11 = vadd.f32 1.0, %v2328_v62  ;;  %v2330_v2 = vpop.eup %2329 }
 0x1ae   : > { %v2212_v8 = vmul.f32 -1.442695, %v2979_v5  ;;  %2335 = vrcp.f32 %v2981_v3  ;;  %v2332_v15 = vpop.eup %2331  ;;  %v2991_v28 = vadd.f32 1.0, %v2330_v2  ;;  %v1505_v30 = vand.u32 2147483648, %v2981_v3 }
 0x1af   : > { %v1361_v54 = vadd.f32 %v1353_v44, %v1336_v1  ;;  %v1436_v46 = vadd.f32 %v1428_v60, %v1411_v61  ;;  %2337 = vrcp.f32 %v2984_v11  ;;  %v2996_v29 = vadd.f32 1.0, %v2332_v15 }
 0x1b0   : > { %2339 = vpow2.f32 %v2212_v8  ;;  %v2334_v4 = vpop.eup %2333  ;;  %v1520_v26 = vand.u32 2147483648, %v2984_v11  ;;  %vm1499_vm1 = vweird.f32 %v2981_v3  ;;  %v1503_v50 = vand.u32 2147483647, %v2981_v3 }
 0x1b1   : > { %v1387_v47 = vadd.f32 %v1379_v48, %v1361_v54  ;;  %v1448_v14 = vmul.f32 %v2907_v23, %v1436_v46  ;;  %2341 = vrcp.f32 %v2991_v28  ;;  %v3003_v32 = vadd.f32 1.0, %v2334_v4 }
 0x1b2   : > { %2343 = vrcp.f32 %v2996_v29  ;;  %v3019_v56 = vor.u32 1.1754944e-38, %v1505_v30  ;;  %vm1514_vm2 = vweird.f32 %v2984_v11  ;;  %vm1529_vm4 = vweird.f32 %v2991_v28 }
 0x1b3   : > { %v1412_v57 = vadd.f32 %v1404_v59, %v1387_v47  ;;  %v2994_v7 = vadd.f32 %v2927_v25, %v1448_v14  ;;  %v1533_v49 = vand.u32 2147483647, %v2991_v28  ;;  %v1535_v53 = vand.u32 2147483648, %v2991_v28 }
 0x1b4   : > { %v3001_v31 = vpop.eup %2335  ;;  %v1521_v22 = vor.u32 1.1754944e-38, %v1520_v26  ;;  %v1548_v19 = vand.u32 2147483647, %v2996_v29  ;;  %vm3038_vm6 = vcmp.eq.f32.partialorder %v1503_v50, 8.507059e+37  ;;  %v1550_v46 = vand.u32 2147483648, %v2996_v29 }
 0x1b5   : > { %v1437_v27 = vadd.f32 %v1429_v37, %v1412_v57  ;;  %v2213_v10 = vmul.f32 -1.442695, %v2994_v7  ;;  %v3006_v33 = vpop.eup %2337  ;;  %v1495_v24 = vmul.f32 %v3001_v31, %v2981_v3  ;;  %vm1500_vm5 = vweird.f32 %v3001_v31 }
 0x1b6   : > { %v1510_v58 = vmul.f32 %v3006_v33, %v2984_v11  ;;  %v2340_v42 = vpop.eup %2339  ;;  %vm1515_vm7 = vweird.f32 %v3006_v33  ;;  %vm3049_vm10 = vcmp.eq.f32.partialorder %v1533_v49, 8.507059e+37  ;;  %v1536_v59 = vor.u32 1.1754944e-38, %v1535_v53  ;;  %vm3069_vm15 = vmor %vm1499_vm1, %vm1500_vm5 }
 0x1b7   : > { %v1449_v38 = vmul.f32 %v2907_v23, %v1437_v27  ;;  %2345 = vpow2.f32 %v2213_v10  ;;  %v1496_v9 = vsub.f32 1.0, %v1495_v24  ;;  %v1518_v23 = vand.u32 2147483647, %v2984_v11  ;;  %v3023_v39 = vpop.eup %2341  ;;  %vm3082_vm12 = vmor %vm1514_vm2, %vm1515_vm7 }
 0x1b8   : > { %v1511_v35 = vsub.f32 1.0, %v1510_v58  ;;  %2347 = vrcp.f32 %v3003_v32  ;;  %v1525_v48 = vmul.f32 %v3023_v39, %v2991_v28  ;;  %v2344_v6 = vpop.eup %2343  ;;  %v3033_v36 = vadd.f32 1.0, %v2340_v42 }
 0x1b9   : > { %v3017_v17 = vadd.f32 %v2927_v25, %v1449_v38  ;;  %v1497_v43 = vmul.f32 %v3001_v31, %v1496_v9  ;;  %vm3043_vm8 = vcmp.eq.f32.partialorder %v1518_v23, 8.507059e+37  ;;  %v1540_v62 = vmul.f32 %v2344_v6, %v2996_v29 }
 0x1ba   : > { %v1512_v55 = vmul.f32 %v3006_v33, %v1511_v35  ;;  %v1526_v60 = vsub.f32 1.0, %v1525_v48  ;;  %vm1544_vm11 = vweird.f32 %v2996_v29  ;;  %vm1530_vm13 = vweird.f32 %v3023_v39 }
 0x1bb   : > { %v2214_v25 = vmul.f32 -1.442695, %v3017_v17  ;;  %v1498_v0 = vadd.f32 %v3001_v31, %v1497_v43  ;;  %v1541_v47 = vsub.f32 1.0, %v1540_v62  ;;  %vm3060_vm14 = vcmp.eq.f32.partialorder %v1548_v19, 8.507059e+37  ;;  %vm3095_vm1 = vmor %vm1529_vm4, %vm1530_vm13 }
 0x1bc   : > { %v1513_v8 = vadd.f32 %v3006_v33, %v1512_v55  ;;  %v1527_v2 = vmul.f32 %v3023_v39, %v1526_v60  ;;  %vm1545_vm0 = vweird.f32 %v2344_v6  ;;  %v1551_v38 = vor.u32 1.1754944e-38, %v1550_v46 }
 0x1bd   : > { %v2346_v1 = vpop.eup %2345  ;;  %2349 = vpow2.f32 %v2214_v25  ;;  %v1542_v27 = vmul.f32 %v2344_v6, %v1541_v47  ;;  %v1502_v30 = vsel %vm3069_vm15, %v3001_v31, %v1498_v0  ;;  %v1563_v24 = vand.u32 2147483647, %v3003_v32 }
 0x1be   : > { %v2348_v37 = vpop.eup %2347  ;;  %v3057_v14 = vadd.f32 1.0, %v2346_v1  ;;  %2351 = vrcp.f32 %v3033_v36  ;;  %v1528_v4 = vadd.f32 %v3023_v39, %v1527_v2  ;;  %v1565_v26 = vand.u32 2147483648, %v3003_v32 }
 0x1bf   : > { %v1555_v10 = vmul.f32 %v2348_v37, %v3003_v32  ;;  %v1517_v58 = vsel %vm3082_vm12, %v3006_v33, %v1513_v8  ;;  %v1543_v31 = vadd.f32 %v2344_v6, %v1542_v27  ;;  %v1578_v9 = vand.u32 2147483647, %v3033_v36  ;;  %vm3108_vm12 = vmor %vm1544_vm11, %vm1545_vm0 }
 0x1c0   : > { %v1532_v35 = vsel %vm3095_vm1, %v3023_v39, %v1528_v4  ;;  %v1580_v28 = vand.u32 2147483648, %v3033_v36  ;;  %2353 = vrcp.f32 %v3057_v14  ;;  %vm1559_vm2 = vweird.f32 %v3003_v32 }
 0x1c1   : > { %v1556_v42 = vsub.f32 1.0, %v1555_v10  ;;  %v1547_v49 = vsel %vm3108_vm12, %v2344_v6, %v1543_v31  ;;  %vm1560_vm4 = vweird.f32 %v2348_v37  ;;  %v1507_v29 = vsel %vm3038_vm6, %v3019_v56, %v1502_v30 }
 0x1c2   : > { %v1522_v39 = vsel %vm3043_vm8, %v1521_v22, %v1517_v58  ;;  %vm3122_vm5 = vcmp.eq.f32.partialorder %v1563_v24, 8.507059e+37  ;;  %v1537_v48 = vsel %vm3049_vm10, %v1536_v59, %v1532_v35  ;;  %v1566_v32 = vor.u32 1.1754944e-38, %v1565_v26  ;;  %vm1561_vm6 = vmor %vm1559_vm2, %vm1560_vm4 }
 0x1c3   : > { %v2350_v50 = vpop.eup %2349  ;;  %v1557_v53 = vmul.f32 %v2348_v37, %v1556_v42  ;;  %v1552_v19 = vsel %vm3060_vm14, %v1551_v38, %v1547_v49  ;;  %vm1574_vm7 = vweird.f32 %v3033_v36  ;;  %vm3133_vm8 = vcmp.eq.f32.partialorder %v1578_v9, 8.507059e+37 }
 0x1c4   : > { %v3100_v23 = vadd.f32 1.0, %v2350_v50  ;;  %v2352_v25 = vpop.eup %2351  ;;  %v1581_v22 = vor.u32 1.1754944e-38, %v1580_v28  ;;  %vm1589_vm11 = vweird.f32 %v3057_v14  ;;  %v3139_v61 = vmul.f32 %v1507_v29, %v2941_v45 }
 0x1c5   : > { %v1558_v6 = vadd.f32 %v2348_v37, %v1557_v53  ;;  %v1570_v55 = vmul.f32 %v2352_v25, %v3033_v36  ;;  %v3142_v60 = vmul.f32 %v1522_v39, %v2944_v21  ;;  %v1593_v54 = vand.u32 2147483647, %v3057_v14 }
 0x1c6   : > { %2355 = vrcp.f32 %v3100_v23  ;;  %v2354_v62 = vpop.eup %2353  ;;  %v1595_v59 = vand.u32 2147483648, %v3057_v14  ;;  %v3149_v46 = vmul.f32 %v1537_v48, %v2951_v63  ;;  %vm1575_vm10 = vweird.f32 %v2352_v25 }
 0x1c7   : > { %v1562_v1 = vsel %vm1561_vm6, %v2348_v37, %v1558_v6  ;;  %v1571_v44 = vsub.f32 1.0, %v1570_v55  ;;  %v1585_v2 = vmul.f32 %v2354_v62, %v3057_v14  ;;  %v3153_v45 = vmul.f32 %v1552_v19, %v2954_v20  ;;  %vm1576_vm13 = vmor %vm1574_vm7, %vm1575_vm10 }
 0x1c8   : > { %v1567_v0 = vsel %vm3122_vm5, %v1566_v32, %v1562_v1  ;;  %v1608_v47 = vand.u32 2147483647, %v3100_v23  ;;  %v1622_v15 = vsel %vm1178_vm9, %v3139_v61, 0.0  ;;  %v1623_v63 = vsel %vm1178_vm9, %v3142_v60, 0.0 }
 0x1c9   : > { %v1572_v8 = vmul.f32 %v2352_v25, %v1571_v44  ;;  %v3157_v37 = vmul.f32 %v1567_v0, %v2970_v34  ;;  %v1586_v4 = vsub.f32 1.0, %v1585_v2  ;;  %v1625_v20 = vsel %vm1178_vm9, %v3149_v46, 0.0 }
 0x1ca   : > { %vm1590_vm14 = vweird.f32 %v2354_v62  ;;  %v1624_v10 = vadd.f32 %v1623_v63, %v1622_v15  ;;  %v1627_v34 = vsel %vm1178_vm9, %v3153_v45, 0.0  ;;  %v1779_v30 = vpack.c.bf16 %v3142_v60, %v3139_v61  ;;  %v1860_v61 = vld [vmem:[%s3478_s17] sm:$0xf] }
 0x1cb   : > { %v1573_v57 = vadd.f32 %v2352_v25, %v1572_v8  ;;  %v1587_v38 = vmul.f32 %v2354_v62, %v1586_v4  ;;  %v1780_v26 = vpack.c.bf16 %v3153_v45, %v3149_v46  ;;  %v1610_v36 = vand.u32 2147483648, %v3100_v23  ;;  %vm1591_vm0 = vmor %vm1589_vm11, %vm1590_vm14  ;;  %v1692_v8 = vld [vmem:[%s3473_s12] sm:$0x3] }
 0x1cc   : > { %v2356_v21 = vpop.eup %2355  ;;  %v1626_v58 = vadd.f32 %v1625_v20, %v1624_v10  ;;  %v1629_v9 = vsel %vm1178_vm9, %v3157_v37, 0.0  ;;  %v1596_v35 = vor.u32 1.1754944e-38, %v1595_v59  ;;  %vm1604_vm1 = vweird.f32 %v3100_v23  ;;  %v2257_v45 = vld [vmem:[%s3476_s15] ss:$0 sm:$0xff] }
 0x1cd   : > { %v1600_v27 = vmul.f32 %v2356_v21, %v3100_v23  ;;  %v1577_v3 = vsel %vm1576_vm13, %v2352_v25, %v1573_v57  ;;  %vm1605_vm15 = vweird.f32 %v2356_v21  ;;  %v1588_v11 = vadd.f32 %v2354_v62, %v1587_v38 }
 0x1ce   : > { %v1582_v50 = vsel %vm3133_vm8, %v1581_v22, %v1577_v3  ;;  %v1628_v33 = vadd.f32 %v1627_v34, %v1626_v58  ;;  %vm1594_vm12 = vcmp.eq.f32.partialorder %v1593_v54, 8.507059e+37  ;;  %vm1606_vm2 = vmor %vm1604_vm1, %vm1605_vm15  ;;  %vm1609_vm4 = vcmp.eq.f32.partialorder %v1608_v47, 8.507059e+37  ;;  %v1693_v58 = vld [vmem:[%s3474_s13] sm:$0x1] }
 0x1cf   : > { %v1601_v24 = vsub.f32 1.0, %v1600_v27  ;;  %v3178_v42 = vmul.f32 %v1582_v50, %v2979_v5  ;;  %v1592_v28 = vsel %vm1591_vm0, %v2354_v62, %v1588_v11  ;;  %v1611_v5 = vor.u32 1.1754944e-38, %v1610_v36 }
 0x1d0   : > { %v1597_v25 = vsel %vm1594_vm12, %v1596_v35, %v1592_v28  ;;  %v1630_v29 = vadd.f32 %v1629_v9, %v1628_v33  ;;  %vm1698_vm5 = vcmask 1041408   ;;  %vm1694_vm10 = vcmask 15360  }
 0x1d1   : > { %v1602_v31 = vmul.f32 %v2356_v21, %v1601_v24  ;;  %v1631_v53 = vsel %vm1178_vm9, %v3178_v42, 0.0  ;;  %v1781_v39 = vpack.c.bf16 %v3178_v42, %v3157_v37  ;;  %v3192_v43 = vmul.f32 %v1597_v25, %v2994_v7  ;;  %2217 = vmatpush.msk.msra.mxu3 %vm1698_vm5, %v1692_v8 }
 0x1d2   : > { %v1632_v48 = vadd.f32 %v1631_v53, %v1630_v29  ;;  %v1874_v60 = vsel %vm961_vm3, %v1860_v61, 0  ;;  %vm3530_vm3 = vcmask 64512  }
 0x1d3   : > { %v1603_v49 = vadd.f32 %v2356_v21, %v1602_v31  ;;  %v1633_v32 = vsel %vm1178_vm9, %v3192_v43, 0.0  ;;  %1883 = vmatpush.bf16.msra.mxu2 %v1874_v60  ;;  %vm3531_vm1 = vmmov %vm3530_vm3 }
 0x1d4   : > { %v1634_v55 = vadd.f32 %v1633_v32, %v1632_v48  ;;  %vm3532_vm12 = vmmov %vm3531_vm1 }
 0x1d5   : > { %v1607_v14 = vsel %vm1606_vm2, %v2356_v21, %v1603_v49  ;;  %vm3533_vm2 = vmmov %vm3531_vm1 }
 0x1d6   : > { %v1612_v23 = vsel %vm1609_vm4, %v1611_v5, %v1607_v14  ;;  %v1741_v14 = vld [vmem:[%s3475_s14] sm:$0xf] }
 0x1d7   : > { %v3195_v6 = vmul.f32 %v1612_v23, %v3017_v17  ;;  %v1648_v17 = vld [vmem:[%s3472_s11] sm:$0x1] }
 0x1d9   : > { %v1635_v19 = vsel %vm1178_vm9, %v3195_v6, 0.0  ;;  %v1782_v7 = vpack.c.bf16 %v3195_v6, %v3192_v43 }
 0x1da   : > { %v1636_v56 = vadd.f32 %v1635_v19, %v1634_v55  ;;  %v1742_v55 = vunpack.c.l.bf16 %v1741_v14 }
 0x1dc   : > { %v1637_v22 = vrot.slane %v1636_v56, 4 }
 0x1de   : > { %v1638_v1 = vadd.f32 %v1637_v22, %v1636_v56 }
 0x1e0   : > { %v1639_v44 = vrot.slane %v1638_v1, 2 }
 0x1e2   : > { %v1640_v62 = vadd.f32 %v1639_v44, %v1638_v1 }
 0x1e4   : > { %v1641_v0 = vrot.slane %v1640_v62, 1 }
 0x1e6   : > { %v1642_v54 = vadd.f32 %v1641_v0, %v1640_v62 }
 0x1e8   : > { %v1643_v59 = vmul.f32 0.015625, %v1642_v54 }
 0x1ea   : > { %2215 = vmatmul.msk.f32.vlgmr.msrb.gmra.mxu1 %vm1178_vm9, %v1643_v59 }
 0x267   : > { %v1669_v2 = vpop.f32.mrf.mxu1 }
 0x268   : > { %v1670_v21 = vadd.f32 %v1669_v2, %v1648_v17 }
 0x26a   : > { %v2216_v47 = vmul.f32 -1.442695, %v1670_v21 }
 0x26c   : > { %2357 = vpow2.f32 %v2216_v47 }
 0x272   : > { %v2358_v15 = vpop.eup %2357 }
 0x273   : > { %v1675_v63 = vadd.f32 1.0, %v2358_v15 }
 0x275   : > { %2359 = vrcp.f32 %v1675_v63  ;;  %v1687_v20 = vand.u32 2147483648, %v1675_v63  ;;  %v1685_v34 = vand.u32 2147483647, %v1675_v63  ;;  %vm1681_vm7 = vweird.f32 %v1675_v63 }
 0x277   : > { %v1688_v38 = vor.u32 1.1754944e-38, %v1687_v20  ;;  %vm1686_vm11 = vcmp.eq.f32.partialorder %v1685_v34, 8.507059e+37 }
 0x27b   : > { %v2360_v57 = vpop.eup %2359 }
 0x27c   : > { %v1677_v4 = vmul.f32 %v2360_v57, %v1675_v63  ;;  %vm1682_vm6 = vweird.f32 %v2360_v57 }
 0x27d   : > { %vm1683_vm8 = vmor %vm1681_vm7, %vm1682_vm6 }
 0x27e   : > { %v1678_v27 = vsub.f32 1.0, %v1677_v4 }
 0x280   : > { %v1679_v10 = vmul.f32 %v2360_v57, %v1678_v27 }
 0x282   : > { %v1680_v3 = vadd.f32 %v2360_v57, %v1679_v10 }
 0x284   : > { %v1684_v24 = vsel %vm1683_vm8, %v2360_v57, %v1680_v3 }
 0x285   : > { %v1689_v50 = vsel %vm1686_vm11, %v1688_v38, %v1684_v24 }
 0x286   : > { %v1691_v36 = vmul.f32 %v1689_v50, %v1670_v21 }
 0x288   : > { %2218 = vmatmul.msk.f32.vlgmr.msra.gmra.mxu3 %vm1694_vm10, %v1691_v36 }
 0x30b   : > { %v1719_v11 = vpop.f32.mrf.mxu3 }
 0x30c   : > { %v1720_v31 = vadd.f32 %v1719_v11, %v1693_v58 }
 0x30e   : > { %v2219_v9 = vmul.f32 -1.442695, %v1720_v31 }
 0x310   : > { %2361 = vpow2.f32 %v2219_v9 }
 0x316   : > { %v2362_v35 = vpop.eup %2361 }
 0x317   : > { %v1725_v33 = vadd.f32 1.0, %v2362_v35 }
 0x319   : > { %2363 = vrcp.f32 %v1725_v33  ;;  %v1737_v25 = vand.u32 2147483648, %v1725_v33  ;;  %v1735_v29 = vand.u32 2147483647, %v1725_v33  ;;  %vm1731_vm14 = vweird.f32 %v1725_v33 }
 0x31b   : > { %v1738_v48 = vor.u32 1.1754944e-38, %v1737_v25  ;;  %vm1736_vm0 = vcmp.eq.f32.partialorder %v1735_v29, 8.507059e+37 }
 0x31f   : > { %v2364_v28 = vpop.eup %2363 }
 0x320   : > { %v1727_v49 = vmul.f32 %v2364_v28, %v1725_v33  ;;  %vm1732_vm13 = vweird.f32 %v2364_v28 }
 0x321   : > { %vm1733_vm15 = vmor %vm1731_vm14, %vm1732_vm13 }
 0x322   : > { %v1728_v53 = vsub.f32 1.0, %v1727_v49  ;;  %v3263_v49 = vld [vmem:[%s3480_s19] ss:$0 sm:$0xff] }
 0x324   : > { %v1729_v5 = vmul.f32 %v2364_v28, %v1728_v53 }
 0x326   : > { %v1730_v23 = vadd.f32 %v2364_v28, %v1729_v5 }
 0x328   : > { %v1734_v32 = vsel %vm1733_vm15, %v2364_v28, %v1730_v23 }
 0x329   : > { %v1739_v19 = vsel %vm1736_vm0, %v1738_v48, %v1734_v32 }
 0x32a   : > { %v1743_v56 = vperm.slane %v1739_v19, 0 }
 0x32c   : > { %v1744_v22 = vmul.f32 %v1743_v56, %v1742_v55 }
 0x32e   : > { %1745 = vxpose.xlu0.b32.start.end [1/1] (short) (narrow) %v1744_v22, 32 }
 0x3d2   : > { %v1761_v1 = vpop.trf.xlu0 }
 0x3da   : > { %v1762_v44 = vpop.trf.xlu0 }
 0x3db   : > { %v1777_v59 = vpack.c.bf16 %v1762_v44, %v1761_v1 }
 0x3e2   : > { %v1763_v62 = vpop.trf.xlu0 }
 0x3ea   : > { %v1764_v0 = vpop.trf.xlu0 }
 0x3eb   : > { %v1778_v54 = vpack.c.bf16 %v1764_v0, %v1763_v62 }
 0x3ed   : > { %1801 = vmatpush.bf16.msrb.mxu3 %v1778_v54 }
 0x3f1   : > { %1802 = vmatpush.bf16.msrb.mxu3 %v1777_v59 }
 0x3f4   : > { %2220 = vmatmul.msk.bf16.vlgmr.msrb.gmra.mxu3 %vm1178_vm9, %v1779_v30  ;;  %v2258_v30 = vld [vmem:[%s3477_s16] ss:$0 sm:$0xff] }
 0x404   : > { %2221 = vmatmul.msk.bf16.gmra.mxu3 %vm1178_vm9, %v1780_v26 }
 0x414   : > { %2222 = vmatmul.msk.bf16.gmra.mxu3 %vm1178_vm9, %v1781_v39 }
 0x424   : > { %2223 = vmatmul.msk.bf16.gmra.mxu3 %vm1178_vm9, %v1782_v7 }
 0x477   : > { %v1804_v46 = vpop.f32.mrf.mxu3 }
 0x478   : > { %v1828_v37 = vmul.f32 %v2257_v45, %v1804_v46 }
 0x47a   : > { %v1840_v42 = vadd.f32 %v2258_v30, %v1828_v37 }
 0x47c   : > { %v1848_v6 = vadd.f32 %v1840_v42, %v2592_v12 }
 0x47f   : > { %v1806_v26 = vpop.f32.mrf.mxu3 }
 0x480   : > { %v1829_v39 = vmul.f32 %v2257_v45, %v1806_v26 }
 0x482   : > { %v1841_v43 = vadd.f32 %v2258_v30, %v1829_v39 }
 0x484   : > { %v1849_v7 = vadd.f32 %v1841_v43, %v2595_v13 }
 0x486   : > { %v1856_v17 = vpack.c.bf16 %v1849_v7, %v1848_v6 }
 0x487   : > { %v1809_v8 = vpop.f32.mrf.mxu3 }
 0x488   : > { %2224 = vmatmul.msk.bf16.vlgmr.msra.gmra.mxu2 %vm3530_vm3, %v1856_v17  ;;  %v1830_v2 = vmul.f32 %v2257_v45, %v1809_v8 }
 0x48a   : > { %v1842_v47 = vadd.f32 %v2258_v30, %v1830_v2 }
 0x48c   : > { %v1850_v57 = vadd.f32 %v1842_v47, %v2618_v51 }
 0x48f   : > { %v1811_v21 = vpop.f32.mrf.mxu3 }
 0x490   : > { %v1831_v15 = vmul.f32 %v2257_v45, %v1811_v21 }
 0x492   : > { %v1843_v63 = vadd.f32 %v2258_v30, %v1831_v15 }
 0x494   : > { %v1851_v4 = vadd.f32 %v1843_v63, %v2621_v52 }
 0x496   : > { %v1857_v27 = vpack.c.bf16 %v1851_v4, %v1850_v57 }
 0x497   : > { %v1814_v20 = vpop.f32.mrf.mxu3 }
 0x498   : > { %2225 = vmatmul.msk.bf16.gmra.mxu2 %vm3531_vm1, %v1857_v27  ;;  %v1832_v12 = vmul.f32 %v2257_v45, %v1814_v20 }
 0x49a   : > { %v1844_v13 = vadd.f32 %v2258_v30, %v1832_v12 }
 0x49c   : > { %v1852_v38 = vadd.f32 %v1844_v13, %v2635_v16  ;;  %v3257_v16 = vld [vmem:[%s3479_s18] ss:$0 sm:$0xff] }
 0x49f   : > { %v1816_v10 = vpop.f32.mrf.mxu3 }
 0x4a0   : > { %v1833_v34 = vmul.f32 %v2257_v45, %v1816_v10 }
 0x4a2   : > { %v1845_v3 = vadd.f32 %v2258_v30, %v1833_v34 }
 0x4a4   : > { %v1853_v24 = vadd.f32 %v1845_v3, %v2638_v18 }
 0x4a6   : > { %v1858_v50 = vpack.c.bf16 %v1853_v24, %v1852_v38 }
 0x4a7   : > { %v1819_v36 = vpop.f32.mrf.mxu3 }
 0x4a8   : > { %2226 = vmatmul.msk.bf16.gmra.mxu2 %vm3532_vm12, %v1858_v50  ;;  %v1834_v51 = vmul.f32 %v2257_v45, %v1819_v36 }
 0x4aa   : > { %v1846_v52 = vadd.f32 %v2258_v30, %v1834_v51 }
 0x4ac   : > { %v1854_v9 = vadd.f32 %v1846_v52, %v2644_v40 }
 0x4af   : > { %v1821_v58 = vpop.f32.mrf.mxu3 }
 0x4b0   : > { %v1835_v11 = vmul.f32 %v2257_v45, %v1821_v58 }
 0x4b2   : > { %v1847_v31 = vadd.f32 %v2258_v30, %v1835_v11 }
 0x4b4   : > { %v1855_v35 = vadd.f32 %v1847_v31, %v2647_v41 }
 0x4b6   : > { %v1859_v33 = vpack.c.bf16 %v1855_v35, %v1854_v9 }
 0x4b8   : > { %2227 = vmatmul.msk.bf16.gmra.mxu2 %vm3533_vm2, %v1859_v33 }
 0x50b   : > { %v1885_v28 = vpop.f32.mrf.mxu2 }
 0x50c   : > { %v1909_v18 = vmul.f32 %v3257_v16, %v1885_v28 }
 0x50e   : > { %v3266_v40 = vadd.f32 %v3263_v49, %v1909_v18 }
 0x510   : > { %v2228_v25 = vmul.f32 -1.442695, %v3266_v40 }
 0x512   : > { %2365 = vpow2.f32 %v2228_v25 }
 0x513   : > { %v1887_v53 = vpop.f32.mrf.mxu2 }
 0x514   : > { %v1910_v41 = vmul.f32 %v3257_v16, %v1887_v53 }
 0x516   : > { %v3271_v5 = vadd.f32 %v3263_v49, %v1910_v41 }
 0x518   : > { %v2229_v23 = vmul.f32 -1.442695, %v3271_v5  ;;  %v2366_v56 = vpop.eup %2365 }
 0x519   : > { %v3283_v1 = vadd.f32 1.0, %v2366_v56 }
 0x51a   : > { %2367 = vpow2.f32 %v2229_v23 }
 0x51b   : > { %v1890_v29 = vpop.f32.mrf.mxu2  ;;  %v1972_v51 = vand.u32 2147483648, %v3283_v1  ;;  %vm1966_vm5 = vweird.f32 %v3283_v1  ;;  %v1970_v11 = vand.u32 2147483647, %v3283_v1 }
 0x51c   : > { %v1911_v14 = vmul.f32 %v3257_v16, %v1890_v29 }
 0x51d   : > { %v1973_v53 = vor.u32 1.1754944e-38, %v1972_v51  ;;  %vm1971_vm8 = vcmp.eq.f32.partialorder %v1970_v11, 8.507059e+37 }
 0x51e   : > { %v3276_v48 = vadd.f32 %v3263_v49, %v1911_v14 }
 0x520   : > { %v2230_v55 = vmul.f32 -1.442695, %v3276_v48  ;;  %v2368_v62 = vpop.eup %2367 }
 0x521   : > { %v3287_v54 = vadd.f32 1.0, %v2368_v62 }
 0x522   : > { %2369 = vpow2.f32 %v2230_v55 }
 0x523   : > { %v1892_v32 = vpop.f32.mrf.mxu2  ;;  %vm1981_vm11 = vweird.f32 %v3287_v54  ;;  %v1987_v14 = vand.u32 2147483648, %v3287_v54 }
 0x524   : > { %v1912_v19 = vmul.f32 %v3257_v16, %v1892_v32 }
 0x526   : > { %v3281_v22 = vadd.f32 %v3263_v49, %v1912_v19 }
 0x528   : > { %v2231_v44 = vmul.f32 -1.442695, %v3281_v22  ;;  %v2370_v61 = vpop.eup %2369 }
 0x529   : > { %v3295_v37 = vadd.f32 1.0, %v2370_v61 }
 0x52a   : > { %2371 = vpow2.f32 %v2231_v44 }
 0x52b   : > { %v1895_v0 = vpop.f32.mrf.mxu2  ;;  %2373 = vrcp.f32 %v3283_v1  ;;  %v2002_v61 = vand.u32 2147483648, %v3295_v37  ;;  %vm1996_vm15 = vweird.f32 %v3295_v37 }
 0x52c   : > { %v1913_v59 = vmul.f32 %v3257_v16, %v1895_v0  ;;  %2375 = vrcp.f32 %v3287_v54 }
 0x52e   : > { %v3291_v60 = vadd.f32 %v3263_v49, %v1913_v59  ;;  %v1988_v59 = vor.u32 1.1754944e-38, %v1987_v14 }
 0x530   : > { %v2232_v46 = vmul.f32 -1.442695, %v3291_v60  ;;  %v2372_v45 = vpop.eup %2371 }
 0x531   : > { %v2374_v30 = vpop.eup %2373  ;;  %v3297_v42 = vadd.f32 1.0, %v2372_v45  ;;  %v2000_v45 = vand.u32 2147483647, %v3295_v37 }
 0x532   : > { %2377 = vpow2.f32 %v2232_v46  ;;  %v1962_v43 = vmul.f32 %v2374_v30, %v3283_v1  ;;  %v3302_v6 = vpop.eup %2375  ;;  %vm1967_vm4 = vweird.f32 %v2374_v30 }
 0x533   : > { %v1897_v26 = vpop.f32.mrf.mxu2  ;;  %2379 = vrcp.f32 %v3295_v37  ;;  %v1977_v21 = vmul.f32 %v3302_v6, %v3287_v54  ;;  %vm3339_vm6 = vmor %vm1966_vm5, %vm1967_vm4  ;;  %vm1982_vm7 = vweird.f32 %v3302_v6  ;;  %vm2011_vm12 = vweird.f32 %v3297_v42 }
 0x534   : > { %v1914_v39 = vmul.f32 %v3257_v16, %v1897_v26  ;;  %2381 = vrcp.f32 %v3297_v42  ;;  %v1963_v2 = vsub.f32 1.0, %v1962_v43  ;;  %vm3355_vm10 = vmor %vm1981_vm11, %vm1982_vm7  ;;  %vm2001_vm2 = vcmp.eq.f32.partialorder %v2000_v45, 8.507059e+37 }
 0x535   : > { %v1978_v27 = vsub.f32 1.0, %v1977_v21 }
 0x536   : > { %v3305_v7 = vadd.f32 %v3263_v49, %v1914_v39  ;;  %v1964_v4 = vmul.f32 %v2374_v30, %v1963_v2  ;;  %v2017_v2 = vand.u32 2147483648, %v3297_v42 }
 0x537   : > { %v1979_v24 = vmul.f32 %v3302_v6, %v1978_v27 }
 0x538   : > { %v2378_v17 = vpop.eup %2377  ;;  %v2233_v8 = vmul.f32 -1.442695, %v3305_v7  ;;  %v1965_v38 = vadd.f32 %v2374_v30, %v1964_v4 }
 0x539   : > { %v3311_v47 = vadd.f32 1.0, %v2378_v17  ;;  %v3313_v15 = vpop.eup %2379  ;;  %v1980_v28 = vadd.f32 %v3302_v6, %v1979_v24  ;;  %v2018_v24 = vor.u32 1.1754944e-38, %v2017_v2 }
 0x53a   : > { %2383 = vpow2.f32 %v2233_v8  ;;  %v3317_v20 = vpop.eup %2381  ;;  %v1992_v12 = vmul.f32 %v3313_v15, %v3295_v37  ;;  %v1969_v33 = vsel %vm3339_vm6, %v2374_v30, %v1965_v38  ;;  %vm1997_vm13 = vweird.f32 %v3313_v15 }
 0x53b   : > { %2385 = vrcp.f32 %v3311_v47  ;;  %v1900_v63 = vpop.f32.mrf.mxu2  ;;  %v2007_v50 = vmul.f32 %v3317_v20, %v3297_v42  ;;  %v1974_v32 = vsel %vm1971_vm8, %v1973_v53, %v1969_v33  ;;  %vm3380_vm0 = vmor %vm1996_vm15, %vm1997_vm13  ;;  %vm2012_vm3 = vweird.f32 %v3317_v20 }
 0x53c   : > { %v1915_v57 = vmul.f32 %v3257_v16, %v1900_v63  ;;  %v1993_v58 = vsub.f32 1.0, %v1992_v12  ;;  %v2081_v46 = vmul.f32 %v1974_v32, %v3266_v40  ;;  %v2003_v8 = vor.u32 1.1754944e-38, %v2002_v61  ;;  %vm3397_vm4 = vmor %vm2011_vm12, %vm2012_vm3 }
 0x53d   : > { %v2008_v18 = vsub.f32 1.0, %v2007_v50  ;;  %v2032_v21 = vand.u32 2147483648, %v3311_v47  ;;  %vm2026_vm5 = vweird.f32 %v3311_v47 }
 0x53e   : > { %v3322_v10 = vadd.f32 %v3263_v49, %v1915_v57  ;;  %v1994_v41 = vmul.f32 %v3313_v15, %v1993_v58 }
 0x53f   : > { %v2009_v1 = vmul.f32 %v3317_v20, %v2008_v18  ;;  %v2033_v50 = vor.u32 1.1754944e-38, %v2032_v21 }
 0x540   : > { %v2384_v13 = vpop.eup %2383  ;;  %v2234_v34 = vmul.f32 -1.442695, %v3322_v10  ;;  %v1995_v62 = vadd.f32 %v3313_v15, %v1994_v41 }
 0x541   : > { %v3325_v3 = vpop.eup %2385  ;;  %v3330_v36 = vadd.f32 1.0, %v2384_v13  ;;  %v2010_v43 = vadd.f32 %v3317_v20, %v2009_v1 }
 0x542   : > { %v2022_v52 = vmul.f32 %v3325_v3, %v3311_v47  ;;  %2387 = vpow2.f32 %v2234_v34  ;;  %v1999_v40 = vsel %vm3380_vm0, %v3313_v15, %v1995_v62  ;;  %vm2027_vm1 = vweird.f32 %v3325_v3 }
 0x543   : > { %2389 = vrcp.f32 %v3330_v36  ;;  %v1902_v31 = vpop.f32.mrf.mxu2  ;;  %v2030_v15 = vand.u32 2147483647, %v3311_v47  ;;  %v2004_v12 = vsel %vm2001_vm2, %v2003_v8, %v1999_v40  ;;  %vm3412_vm7 = vmor %vm2026_vm5, %vm2027_vm1  ;;  %v2047_v51 = vand.u32 2147483648, %v3330_v36 }
 0x544   : > { %v1916_v35 = vmul.f32 %v3257_v16, %v1902_v31  ;;  %v2023_v25 = vsub.f32 1.0, %v2022_v52  ;;  %v1985_v16 = vand.u32 2147483647, %v3287_v54  ;;  %v2045_v58 = vand.u32 2147483647, %v3330_v36 }
 0x545   : > { %vm2031_vm11 = vcmp.eq.f32.partialorder %v2030_v15, 8.507059e+37  ;;  %v2083_v11 = vmul.f32 %v2004_v12, %v3276_v48  ;;  %v2048_v18 = vor.u32 1.1754944e-38, %v2047_v51  ;;  %v2111_v12 = vld [vmem:[%s3481_s20] sm:$0x1] }
 0x546   : > { %v3350_v29 = vadd.f32 %v3263_v49, %v1916_v35  ;;  %v1984_v49 = vsel %vm3355_vm10, %v3302_v6, %v1980_v28  ;;  %v2024_v0 = vmul.f32 %v3325_v3, %v2023_v25  ;;  %vm1986_vm14 = vcmp.eq.f32.partialorder %v1985_v16, 8.507059e+37 }
 0x547   : > { %v1989_v26 = vsel %vm1986_vm14, %v1988_v59, %v1984_v49  ;;  %v2015_v6 = vand.u32 2147483647, %v3297_v42  ;;  %v2014_v42 = vsel %vm3397_vm4, %v3317_v20, %v2010_v43  ;;  %vm2041_vm10 = vweird.f32 %v3330_v36 }
 0x548   : > { %v2388_v23 = vpop.eup %2387  ;;  %v2235_v19 = vmul.f32 -1.442695, %v3350_v29  ;;  %v2025_v37 = vadd.f32 %v3325_v3, %v2024_v0  ;;  %v2082_v57 = vmul.f32 %v1989_v26, %v3271_v5  ;;  %vm2046_vm15 = vcmp.eq.f32.partialorder %v2045_v58, 8.507059e+37 }
 0x549   : > { %v3360_v56 = vpop.eup %2389  ;;  %v3367_v44 = vadd.f32 1.0, %v2388_v23  ;;  %vm3406_vm6 = vcmp.eq.f32.partialorder %v2015_v6, 8.507059e+37  ;;  %v2089_v16 = vsel %vm1178_vm9, %v2081_v46, 0.0  ;;  %v2092_v55 = vsel %vm1178_vm9, %v2083_v11, 0.0 }
 0x54a   : > { %v2037_v54 = vmul.f32 %v3360_v56, %v3330_v36  ;;  %2391 = vpow2.f32 %v2235_v19  ;;  %v2029_v47 = vsel %vm3412_vm7, %v3325_v3, %v2025_v37  ;;  %vm2042_vm8 = vweird.f32 %v3360_v56 }
 0x54b   : > { %2393 = vrcp.f32 %v3367_v44  ;;  %v2019_v3 = vsel %vm3406_vm6, %v2018_v24, %v2014_v42  ;;  %v2034_v31 = vsel %vm2031_vm11, %v2033_v50, %v2029_v47  ;;  %vm3428_vm13 = vmor %vm2041_vm10, %vm2042_vm8  ;;  %v2062_v35 = vand.u32 2147483648, %v3367_v44 }
 0x54c   : > { %v2038_v30 = vsub.f32 1.0, %v2037_v54  ;;  %v2060_v36 = vand.u32 2147483647, %v3367_v44  ;;  %v2090_v48 = vsel %vm1178_vm9, %v2082_v57, 0.0  ;;  %v2084_v53 = vmul.f32 %v2019_v3, %v3281_v22 }
 0x54d   : > { %vm2056_vm0 = vweird.f32 %v3367_v44  ;;  %v2085_v14 = vmul.f32 %v2034_v31, %v3291_v60  ;;  %v2063_v32 = vor.u32 1.1754944e-38, %v2062_v35  ;;  %v2091_v49 = vadd.f32 %v2090_v48, %v2089_v16 }
 0x54e   : > { %v2039_v17 = vmul.f32 %v3360_v56, %v2038_v30  ;;  %vm2061_vm1 = vcmp.eq.f32.partialorder %v2060_v36, 8.507059e+37  ;;  %v2094_v22 = vsel %vm1178_vm9, %v2084_v53, 0.0  ;;  %vm2113_vm6 = vcmask 253952  }
 0x54f   : > { %v2093_v0 = vadd.f32 %v2092_v55, %v2091_v49  ;;  %v2096_v54 = vsel %vm1178_vm9, %v2085_v14, 0.0 }
 0x550   : > { %v2392_v63 = vpop.eup %2391  ;;  %v2040_v38 = vadd.f32 %v3360_v56, %v2039_v17 }
 0x551   : > { %v2394_v27 = vpop.eup %2393  ;;  %v1960_v34 = vadd.f32 1.0, %v2392_v63  ;;  %v2095_v45 = vadd.f32 %v2094_v22, %v2093_v0 }
 0x552   : > { %v2052_v20 = vmul.f32 %v2394_v27, %v3367_v44  ;;  %v2044_v33 = vsel %vm3428_vm13, %v3360_v56, %v2040_v38  ;;  %vm2057_vm14 = vweird.f32 %v2394_v27 }
 0x553   : > { %2395 = vrcp.f32 %v1960_v34  ;;  %v2049_v23 = vsel %vm2046_vm15, %v2048_v18, %v2044_v33  ;;  %vm2058_vm3 = vmor %vm2056_vm0, %vm2057_vm14  ;;  %v2077_v59 = vand.u32 2147483648, %v1960_v34  ;;  %v2075_v46 = vand.u32 2147483647, %v1960_v34 }
 0x554   : > { %v2053_v52 = vsub.f32 1.0, %v2052_v20  ;;  %v2086_v62 = vmul.f32 %v2049_v23, %v3305_v7  ;;  %vm2071_vm2 = vweird.f32 %v1960_v34  ;;  %v2097_v39 = vadd.f32 %v2096_v54, %v2095_v45 }
 0x555   : > { %v2078_v43 = vor.u32 1.1754944e-38, %v2077_v59  ;;  %vm2076_vm5 = vcmp.eq.f32.partialorder %v2075_v46, 8.507059e+37 }
 0x556   : > { %v2054_v28 = vmul.f32 %v2394_v27, %v2053_v52  ;;  %v2098_v30 = vsel %vm1178_vm9, %v2086_v62, 0.0 }
 0x557   : > { %v2099_v40 = vadd.f32 %v2098_v30, %v2097_v39 }
 0x558   : > { %v2055_v41 = vadd.f32 %v2394_v27, %v2054_v28 }
 0x559   : > { %v2396_v25 = vpop.eup %2395 }
 0x55a   : > { %v2059_v19 = vsel %vm2058_vm3, %v2394_v27, %v2055_v41  ;;  %v2067_v56 = vmul.f32 %v2396_v25, %v1960_v34  ;;  %vm2072_vm12 = vweird.f32 %v2396_v25 }
 0x55b   : > { %v2064_v1 = vsel %vm2061_vm1, %v2063_v32, %v2059_v19  ;;  %vm2073_vm4 = vmor %vm2071_vm2, %vm2072_vm12 }
 0x55c   : > { %v2068_v44 = vsub.f32 1.0, %v2067_v56  ;;  %v2087_v60 = vmul.f32 %v2064_v1, %v3322_v10 }
 0x55e   : > { %v2069_v61 = vmul.f32 %v2396_v25, %v2068_v44  ;;  %v2100_v7 = vsel %vm1178_vm9, %v2087_v60, 0.0 }
 0x55f   : > { %v2101_v10 = vadd.f32 %v2100_v7, %v2099_v40 }
 0x560   : > { %v2070_v26 = vadd.f32 %v2396_v25, %v2069_v61 }
 0x562   : > { %v2074_v6 = vsel %vm2073_vm4, %v2396_v25, %v2070_v26 }
 0x563   : > { %v2079_v37 = vsel %vm2076_vm5, %v2078_v43, %v2074_v6 }
 0x564   : > { %v2088_v17 = vmul.f32 %v2079_v37, %v3350_v29  ;;  %v2117_v29 = vld [vmem:[#allocation3] sm:$0x1] }
 0x566   : > { %v2102_v8 = vsel %vm1178_vm9, %v2088_v17, 0.0  ;;  %vm2119_vm9 = vcmask 0  }
 0x567   : > { %v2103_v2 = vadd.f32 %v2102_v8, %v2101_v10 }
 0x569   : > { %v2104_v21 = vrot.slane %v2103_v2, 4 }
 0x56b   : > { %v2105_v63 = vadd.f32 %v2104_v21, %v2103_v2 }
 0x56d   : > { %v2106_v57 = vrot.slane %v2105_v63, 2 }
 0x56f   : > { %v2107_v4 = vadd.f32 %v2106_v57, %v2105_v63 }
 0x571   : > { %v2108_v15 = vrot.slane %v2107_v4, 1 }
 0x573   : > { %v2109_v27 = vadd.f32 %v2108_v15, %v2107_v4 }
 0x575   : > { %v2110_v42 = vmul.f32 0.015625, %v2109_v27 }
 0x577   : > { %v2112_v13 = vmul.f32 %v2111_v12, %v2110_v42 }
 0x579   : > { %v2114_v5 = vsel %vm2113_vm6, %v2112_v13, 0.0 }
 0x57a   : > { %2115 = vadd.xlane.f32.xlu0 %v2114_v5 }
 0x5ed   : > { %v2116_v34 = vpop.xlane.xlu0 %2115 }
 0x5ee   : > { %v2118_v47 = vadd.f32 %v2117_v29, %v2116_v34 }
 0x5f0   : > { %2120 = vst.msk [vmem:[%s681_s0] sm:$0x1] %vm2119_vm9, %v2118_v47 }
 0x5f1 PF: > { %s34_s29 = sadd.s32 1, %s2403_s29  }
 0x5f2   : > { %p31_p4 = scmp.ge.s32.totalorder %s34_s29, 4  }
 0x5f4   :  { %33 = sbr.rel (!%p31_p4) target bundleno = 8 (0x8), region = 140 }

</bundles_post_ra>
